<compile_context>
chip_gen: v7x
topology: tpu7x:2x2x1
jax: 0.10.0
libtpu: 0.0.40
codegen_flags: <defaults>
</compile_context>

<pallas_src>
import math

import jax
import jax.numpy as jnp
from jax.experimental import pallas as pl
from jax.experimental.pallas import tpu as pltpu

# ---------------- module-consistent config (small shapes) ----------------
EMBED_DIM = 32           # d_model
SEQ_LEN = 6              # seq_len (== max_seq_len of PositionalEncoding)
NHEAD = 4
HEAD_DIM = EMBED_DIM // NHEAD
NUM_LAYERS = 2
FF_DIM = 4 * EMBED_DIM   # ff_dim_factor * embed_dim
OUTPUT_LAYERS = [32, 16, 8]
BATCH = 2
LN_EPS = 1e-5


# ---------------- in-kernel math helpers ----------------
def _erf(x):
    # Abramowitz & Stegun 7.1.26 rational approximation; max abs err ~1.5e-7 (f32-exact).
    a1, a2, a3, a4, a5 = 0.254829592, -0.284496736, 1.421413741, -1.453152027, 1.061405429
    p = 0.3275911
    sgn = jnp.where(x >= 0.0, 1.0, -1.0)
    ax = jnp.abs(x)
    t = 1.0 / (1.0 + p * ax)
    poly = ((((a5 * t + a4) * t + a3) * t + a2) * t + a1) * t
    return sgn * (1.0 - poly * jnp.exp(-ax * ax))


def _gelu_exact(x):
    return 0.5 * x * (1.0 + _erf(x * (1.0 / math.sqrt(2.0))))


def _layer_norm(x, w, b):
    mu = jnp.mean(x, axis=-1, keepdims=True)
    var = jnp.mean(jnp.square(x - mu), axis=-1, keepdims=True)
    return (x - mu) / jnp.sqrt(var + LN_EPS) * w + b


# ---------------- the Pallas kernel (one batch element per grid step) ----------------
def decoder_kernel(*refs):
    (x_ref, pos_ref,
     ln1w_ref, ln1b_ref, wqkv_ref, bqkv_ref, wo_ref, bo_ref,
     ln2w_ref, ln2b_ref, w1_ref, b1_ref, w2_ref, b2_ref) = refs[:14]
    head_refs = refs[14:-1]      # (w0, b0, w1, b1, ...) for the output MLP
    out_ref = refs[-1]

    D = HEAD_DIM
    x = x_ref[0] + pos_ref[...]                            # (S, E)

    for l in range(NUM_LAYERS):
        # ---- self-attention block (pre-norm); heads live on the leading axis ----
        ln_x = _layer_norm(x, ln1w_ref[l], ln1b_ref[l])    # (S, E)
        hb = jnp.broadcast_to(ln_x, (NHEAD, SEQ_LEN, EMBED_DIM))   # (H, S, E), hoisted once

        # Fused Q/K/V projection: (H, S, E) @ (H, E, 3D) -> (H, S, 3D).
        # 1/sqrt(D) is folded into the Q columns of wqkv/bqkv at prep time.
        qkv = jnp.einsum('hse,hef->hsf', hb, wqkv_ref[l],
                         preferred_element_type=jnp.float32) + bqkv_ref[l][:, None, :]
        q = qkv[:, :, 0:D]                                   # (H, S, D)
        k = qkv[:, :, D:2 * D]
        v = qkv[:, :, 2 * D:3 * D]

        s = jnp.einsum('hqd,hkd->hqk', q, k,
                       preferred_element_type=jnp.float32)          # (H, S, S)
        s = s - jnp.max(s, axis=-1, keepdims=True)
        p = jnp.exp(s)
        p = p / jnp.sum(p, axis=-1, keepdims=True)                   # exact softmax (torch-match)

        ctx = jnp.einsum('hqk,hkd->hqd', p, v,
                         preferred_element_type=jnp.float32)         # (H, S, D)
        # head merge folded into the output projection: sum per-head partial outputs
        proj = jnp.einsum('hqd,hdo->hqo', ctx, wo_ref[l],
                          preferred_element_type=jnp.float32)        # (H, S, E)
        attn = jnp.sum(proj, axis=0) + bo_ref[l]                     # (S, E)
        x = x + attn

        # ---- feed-forward block (pre-norm); weights already (in, out) ----
        ln_x = _layer_norm(x, ln2w_ref[l], ln2b_ref[l])
        h1 = _gelu_exact(jnp.dot(ln_x, w1_ref[l],
                                 preferred_element_type=jnp.float32) + b1_ref[l])   # (S, F)
        x = x + jnp.dot(h1, w2_ref[l],
                        preferred_element_type=jnp.float32) + b2_ref[l]             # (S, E)

    # ---- output MLP head; the (S,E)->(S*E) flatten is folded into the first weight ----
    h0w = head_refs[0][...]                                  # (S, E, out0)
    h0b = head_refs[1][...]                                  # (1, out0)
    part = jnp.einsum('sxe,seo->sxo', x[:, None, :], h0w,
                      preferred_element_type=jnp.float32)    # (S, 1, out0)
    y = jnp.maximum(jnp.sum(part, axis=0) + h0b, 0.0)        # (1, out0)

    for i in range(1, len(head_refs) // 2):
        w = head_refs[2 * i][...]                            # (in, out)
        b = head_refs[2 * i + 1][...]                        # (1, out)
        y = jnp.maximum(jnp.dot(y, w, preferred_element_type=jnp.float32) + b, 0.0)

    out_ref[...] = y[None, :, :]                             # (1, 1, out_last)


# ---------------- parameters (deterministic, torch layout) ----------------
def make_pos_enc():
    pos = jnp.arange(SEQ_LEN, dtype=jnp.float32)[:, None]
    div = jnp.exp(jnp.arange(0, EMBED_DIM, 2, dtype=jnp.float32)
                  * (-math.log(10000.0) / EMBED_DIM))
    pe = jnp.zeros((SEQ_LEN, EMBED_DIM), jnp.float32)
    pe = pe.at[:, 0::2].set(jnp.sin(pos * div))
    pe = pe.at[:, 1::2].set(jnp.cos(pos * div))
    return pe[None]                                          # (1, S, E)


def init_params(key):
    keys = [key]

    def next_key():
        keys[0], sub = jax.random.split(keys[0])
        return sub

    def linear(out_dim, in_dim):
        bound = 1.0 / math.sqrt(in_dim)
        w = jax.random.uniform(next_key(), (out_dim, in_dim), jnp.float32, -bound, bound)
        b = jax.random.uniform(next_key(), (out_dim,), jnp.float32, -bound, bound)
        return w, b

    names = ['ln1_w', 'ln1_b', 'wqkv', 'bqkv', 'wo', 'bo',
             'ln2_w', 'ln2_b', 'w1', 'b1', 'w2', 'b2']
    stacks = {n: [] for n in names}
    for _ in range(NUM_LAYERS):
        stacks['ln1_w'].append(jnp.ones((EMBED_DIM,), jnp.float32))
        stacks['ln1_b'].append(jnp.zeros((EMBED_DIM,), jnp.float32))
        wqkv, bqkv = linear(3 * EMBED_DIM, EMBED_DIM)
        stacks['wqkv'].append(wqkv); stacks['bqkv'].append(bqkv)
        wo, bo = linear(EMBED_DIM, EMBED_DIM)
        stacks['wo'].append(wo); stacks['bo'].append(bo)
        stacks['ln2_w'].append(jnp.ones((EMBED_DIM,), jnp.float32))
        stacks['ln2_b'].append(jnp.zeros((EMBED_DIM,), jnp.float32))
        w1, b1 = linear(FF_DIM, EMBED_DIM)
        stacks['w1'].append(w1); stacks['b1'].append(b1)
        w2, b2 = linear(EMBED_DIM, FF_DIM)
        stacks['w2'].append(w2); stacks['b2'].append(b2)

    params = {n: jnp.stack(v) for n, v in stacks.items()}

    # output MLP head: seq*E -> E -> output_layers[0] -> ... -> output_layers[-1]
    dims = [SEQ_LEN * EMBED_DIM, EMBED_DIM] + list(OUTPUT_LAYERS)
    head = []
    for i in range(len(dims) - 1):
        w, b = linear(dims[i + 1], dims[i])
        head.extend([w, b])
    params['head'] = head
    params['pos_enc'] = make_pos_enc()
    return params


def prepare_params(p):
    """Convert torch-layout params into the kernel-ready (pre-transposed/fused) layouts."""
    scale = 1.0 / math.sqrt(HEAD_DIM)
    L, E, H, D = NUM_LAYERS, EMBED_DIM, NHEAD, HEAD_DIM
    wqkv, bqkv = p['wqkv'], p['bqkv']                        # (L, 3E, E), (L, 3E)

    def split_w(w, s=1.0):   # torch (L, E_out, E_in) -> per-head (L, H, E_in, D)
        return jnp.transpose((s * w).reshape(L, H, D, E), (0, 1, 3, 2))

    def split_b(b, s=1.0):   # (L, E_out) -> (L, H, D)
        return (s * b).reshape(L, H, D)

    wq = split_w(wqkv[:, :E, :], scale)                      # 1/sqrt(D) folded into Q
    wk = split_w(wqkv[:, E:2 * E, :])
    wv = split_w(wqkv[:, 2 * E:, :])
    bq = split_b(bqkv[:, :E], scale)
    bk = split_b(bqkv[:, E:2 * E])
    bv = split_b(bqkv[:, 2 * E:])

    kp = {
        'pos': p['pos_enc'][0],                              # (S, E)
        'ln1_w': p['ln1_w'], 'ln1_b': p['ln1_b'],
        # fused per-head QKV projection: columns [0:D]=Q(scaled), [D:2D]=K, [2D:3D]=V
        'wqkv': jnp.concatenate([wq, wk, wv], axis=-1),      # (L, H, E, 3D)
        'bqkv': jnp.concatenate([bq, bk, bv], axis=-1),      # (L, H, 3D)
        # out_proj (L, E_out, H*D) -> per-head (L, H, D, E_out); head merge = sum over H
        'wo': jnp.transpose(p['wo'], (0, 2, 1)).reshape(L, H, D, E),
        'bo': p['bo'],
        'ln2_w': p['ln2_w'], 'ln2_b': p['ln2_b'],
        'w1': jnp.transpose(p['w1'], (0, 2, 1)),             # (L, E, F)
        'b1': p['b1'],
        'w2': jnp.transpose(p['w2'], (0, 2, 1)),             # (L, F, E)
        'b2': p['b2'],
    }

    head = []
    w0, b0 = p['head'][0], p['head'][1]                      # (E, S*E), (E,)
    # flatten folded into weight: flat index = s*E + e  ->  (S, E, out)
    head.append(jnp.transpose(w0).reshape(SEQ_LEN, E, w0.shape[0]))
    head.append(b0.reshape(1, -1))
    for i in range(1, len(p['head']) // 2):
        w, b = p['head'][2 * i], p['head'][2 * i + 1]
        head.append(jnp.transpose(w))                        # (in, out)
        head.append(b.reshape(1, -1))
    kp['head'] = head
    return kp


# ---------------- wrapper ----------------
def multi_layer_decoder(x, kp):
    B = x.shape[0]
    out_last = OUTPUT_LAYERS[-1]

    args = [x, kp['pos'],
            kp['ln1_w'], kp['ln1_b'], kp['wqkv'], kp['bqkv'], kp['wo'], kp['bo'],
            kp['ln2_w'], kp['ln2_b'], kp['w1'], kp['b1'], kp['w2'], kp['b2']] \
        + list(kp['head'])

    def const_spec(a):
        # Whole-array block, same block every grid step (stays VMEM-resident, no re-DMA).
        zeros = (0,) * a.ndim
        return pl.BlockSpec(a.shape, lambda b: zeros)

    in_specs = [pl.BlockSpec((1, SEQ_LEN, EMBED_DIM), lambda b: (b, 0, 0))] \
        + [const_spec(a) for a in args[1:]]
    out_specs = pl.BlockSpec((1, 1, out_last), lambda b: (b, 0, 0))

    out3 = pl.pallas_call(
        decoder_kernel,
        out_shape=jax.ShapeDtypeStruct((B, 1, out_last), jnp.float32),
        grid=(B,),
        in_specs=in_specs,
        out_specs=out_specs,
        compiler_params=pltpu.CompilerParams(
            dimension_semantics=("parallel",)),            # v7x: batch split across TCs
        cost_estimate=pl.CostEstimate(
            flops=650_000, transcendentals=4_000, bytes_accessed=150_000),
    )(*args)
    return out3.reshape(B, out_last)


if __name__ == "__main__":
    key = jax.random.PRNGKey(0)
    kx, kparam = jax.random.split(key)
    x = jax.random.normal(kx, (BATCH, SEQ_LEN, EMBED_DIM), jnp.float32)
    torch_layout_params = init_params(kparam)
    kernel_params = prepare_params(torch_layout_params)

    out = jax.jit(multi_layer_decoder)(x, kernel_params)
    out = jax.block_until_ready(out)

    assert out.shape == (BATCH, OUTPUT_LAYERS[-1]), out.shape
    assert out.dtype == jnp.float32
    assert bool(jnp.all(jnp.isfinite(out)))
    print("KERNEL_OK")
</pallas_src>

<mosaic_0001>
module attributes {stable_mosaic.version = 11 : i64} {
  func.func @decoder_kernel(%arg0: i32, %arg1: memref<1x6x32xf32, #tpu.memory_space<vmem>>, %arg2: memref<6x32xf32, #tpu.memory_space<vmem>>, %arg3: memref<2x32xf32, #tpu.memory_space<vmem>>, %arg4: memref<2x32xf32, #tpu.memory_space<vmem>>, %arg5: memref<2x4x32x24xf32, #tpu.memory_space<vmem>>, %arg6: memref<2x4x24xf32, #tpu.memory_space<vmem>>, %arg7: memref<2x4x8x32xf32, #tpu.memory_space<vmem>>, %arg8: memref<2x32xf32, #tpu.memory_space<vmem>>, %arg9: memref<2x32xf32, #tpu.memory_space<vmem>>, %arg10: memref<2x32xf32, #tpu.memory_space<vmem>>, %arg11: memref<2x32x128xf32, #tpu.memory_space<vmem>>, %arg12: memref<2x128xf32, #tpu.memory_space<vmem>>, %arg13: memref<2x128x32xf32, #tpu.memory_space<vmem>>, %arg14: memref<2x32xf32, #tpu.memory_space<vmem>>, %arg15: memref<6x32x32xf32, #tpu.memory_space<vmem>>, %arg16: memref<1x32xf32, #tpu.memory_space<vmem>>, %arg17: memref<32x32xf32, #tpu.memory_space<vmem>>, %arg18: memref<1x32xf32, #tpu.memory_space<vmem>>, %arg19: memref<32x16xf32, #tpu.memory_space<vmem>>, %arg20: memref<1x16xf32, #tpu.memory_space<vmem>>, %arg21: memref<16x8xf32, #tpu.memory_space<vmem>>, %arg22: memref<1x8xf32, #tpu.memory_space<vmem>>, %arg23: memref<1x1x8xf32, #tpu.memory_space<vmem>>) attributes {dimension_semantics = [#tpu.dimension_semantics<parallel>], iteration_bounds = array<i64: 2>, scalar_prefetch = 0 : i64, scratch_operands = 0 : i64, tpu.core_type = #tpu.core_type<tc>, window_params = [{transform_indices = @transform_0, window_bounds = array<i64: 1, 6, 32>}, {pipeline_mode = #tpu.pipeline_mode<synchronous>, transform_indices = @transform_1, window_bounds = array<i64: 6, 32>}, {pipeline_mode = #tpu.pipeline_mode<synchronous>, transform_indices = @transform_2, window_bounds = array<i64: 2, 32>}, {pipeline_mode = #tpu.pipeline_mode<synchronous>, transform_indices = @transform_3, window_bounds = array<i64: 2, 32>}, {pipeline_mode = #tpu.pipeline_mode<synchronous>, transform_indices = @transform_4, window_bounds = array<i64: 2, 4, 32, 24>}, {pipeline_mode = #tpu.pipeline_mode<synchronous>, transform_indices = @transform_5, window_bounds = array<i64: 2, 4, 24>}, {pipeline_mode = #tpu.pipeline_mode<synchronous>, transform_indices = @transform_6, window_bounds = array<i64: 2, 4, 8, 32>}, {pipeline_mode = #tpu.pipeline_mode<synchronous>, transform_indices = @transform_7, window_bounds = array<i64: 2, 32>}, {pipeline_mode = #tpu.pipeline_mode<synchronous>, transform_indices = @transform_8, window_bounds = array<i64: 2, 32>}, {pipeline_mode = #tpu.pipeline_mode<synchronous>, transform_indices = @transform_9, window_bounds = array<i64: 2, 32>}, {pipeline_mode = #tpu.pipeline_mode<synchronous>, transform_indices = @transform_10, window_bounds = array<i64: 2, 32, 128>}, {pipeline_mode = #tpu.pipeline_mode<synchronous>, transform_indices = @transform_11, window_bounds = array<i64: 2, 128>}, {pipeline_mode = #tpu.pipeline_mode<synchronous>, transform_indices = @transform_12, window_bounds = array<i64: 2, 128, 32>}, {pipeline_mode = #tpu.pipeline_mode<synchronous>, transform_indices = @transform_13, window_bounds = array<i64: 2, 32>}, {pipeline_mode = #tpu.pipeline_mode<synchronous>, transform_indices = @transform_14, window_bounds = array<i64: 6, 32, 32>}, {pipeline_mode = #tpu.pipeline_mode<synchronous>, transform_indices = @transform_15, window_bounds = array<i64: 1, 32>}, {pipeline_mode = #tpu.pipeline_mode<synchronous>, transform_indices = @transform_16, window_bounds = array<i64: 32, 32>}, {pipeline_mode = #tpu.pipeline_mode<synchronous>, transform_indices = @transform_17, window_bounds = array<i64: 1, 32>}, {pipeline_mode = #tpu.pipeline_mode<synchronous>, transform_indices = @transform_18, window_bounds = array<i64: 32, 16>}, {pipeline_mode = #tpu.pipeline_mode<synchronous>, transform_indices = @transform_19, window_bounds = array<i64: 1, 16>}, {pipeline_mode = #tpu.pipeline_mode<synchronous>, transform_indices = @transform_20, window_bounds = array<i64: 16, 8>}, {pipeline_mode = #tpu.pipeline_mode<synchronous>, transform_indices = @transform_21, window_bounds = array<i64: 1, 8>}, {transform_indices = @transform_22, window_bounds = array<i64: 1, 1, 8>}]} {
    %c0 = arith.constant 0 : index
    %c0_0 = arith.constant 0 : index
    %c0_1 = arith.constant 0 : index
    %0 = vector.load %arg1[%c0, %c0_0, %c0_1] : memref<1x6x32xf32, #tpu.memory_space<vmem>>, vector<1x6x32xf32>
    %1 = vector.shape_cast %0 : vector<1x6x32xf32> to vector<6x32xf32>
    %c0_2 = arith.constant 0 : index
    %c0_3 = arith.constant 0 : index
    %2 = vector.load %arg2[%c0_2, %c0_3] : memref<6x32xf32, #tpu.memory_space<vmem>>, vector<6x32xf32>
    %3 = arith.addf %1, %2 : vector<6x32xf32>
    %c0_4 = arith.constant 0 : index
    %c0_5 = arith.constant 0 : index
    %4 = vector.load %arg3[%c0_4, %c0_5] : memref<2x32xf32, #tpu.memory_space<vmem>>, vector<1x32xf32>
    %5 = vector.shape_cast %4 : vector<1x32xf32> to vector<32xf32>
    %c0_6 = arith.constant 0 : index
    %c0_7 = arith.constant 0 : index
    %6 = vector.load %arg4[%c0_6, %c0_7] : memref<2x32xf32, #tpu.memory_space<vmem>>, vector<1x32xf32>
    %7 = vector.shape_cast %6 : vector<1x32xf32> to vector<32xf32>
    %cst = arith.constant dense<0.000000e+00> : vector<6xf32>
    %8 = vector.multi_reduction <add>, %3, %cst [1] : vector<6x32xf32> to vector<6xf32>
    %9 = vector.shape_cast %8 : vector<6xf32> to vector<6x1xf32>
    %cst_8 = arith.constant 3.200000e+01 : f32
    %10 = vector.broadcast %cst_8 : f32 to vector<6x1xf32>
    %11 = arith.divf %9, %10 : vector<6x1xf32>
    %12 = vector.broadcast %11 : vector<6x1xf32> to vector<6x32xf32>
    %13 = arith.subf %3, %12 : vector<6x32xf32>
    %14 = arith.mulf %13, %13 : vector<6x32xf32>
    %cst_9 = arith.constant dense<0.000000e+00> : vector<6xf32>
    %15 = vector.multi_reduction <add>, %14, %cst_9 [1] : vector<6x32xf32> to vector<6xf32>
    %16 = vector.shape_cast %15 : vector<6xf32> to vector<6x1xf32>
    %cst_10 = arith.constant 3.200000e+01 : f32
    %17 = vector.broadcast %cst_10 : f32 to vector<6x1xf32>
    %18 = arith.divf %16, %17 : vector<6x1xf32>
    %19 = vector.broadcast %11 : vector<6x1xf32> to vector<6x32xf32>
    %20 = arith.subf %3, %19 : vector<6x32xf32>
    %cst_11 = arith.constant 9.99999974E-6 : f32
    %21 = vector.broadcast %cst_11 : f32 to vector<6x1xf32>
    %22 = arith.addf %18, %21 : vector<6x1xf32>
    %23 = math.sqrt %22 : vector<6x1xf32>
    %24 = vector.broadcast %23 : vector<6x1xf32> to vector<6x32xf32>
    %25 = arith.divf %20, %24 : vector<6x32xf32>
    %26 = vector.shape_cast %5 : vector<32xf32> to vector<1x32xf32>
    %27 = vector.broadcast %26 : vector<1x32xf32> to vector<6x32xf32>
    %28 = arith.mulf %25, %27 : vector<6x32xf32>
    %29 = vector.shape_cast %7 : vector<32xf32> to vector<1x32xf32>
    %30 = vector.broadcast %29 : vector<1x32xf32> to vector<6x32xf32>
    %31 = arith.addf %28, %30 : vector<6x32xf32>
    %32 = vector.shape_cast %31 : vector<6x32xf32> to vector<1x6x32xf32>
    %33 = vector.broadcast %32 : vector<1x6x32xf32> to vector<4x6x32xf32>
    %c0_12 = arith.constant 0 : index
    %c0_13 = arith.constant 0 : index
    %c0_14 = arith.constant 0 : index
    %c0_15 = arith.constant 0 : index
    %34 = vector.load %arg5[%c0_12, %c0_13, %c0_14, %c0_15] : memref<2x4x32x24xf32, #tpu.memory_space<vmem>>, vector<1x4x32x24xf32>
    %35 = vector.shape_cast %34 : vector<1x4x32x24xf32> to vector<4x32x24xf32>
    "tpu.trace_start"() <{level = 10 : i32, message = "hse,hef->hsf"}> : () -> ()
    %cst_16 = arith.constant dense<0.000000e+00> : vector<4x6x24xf32>
    %36 = tpu.matmul %33, %35, %cst_16 {dimension_numbers = #tpu.dot_dimension_numbers<[2], [1], [1], [2], [0, 0, 0, 1, 1, 2], [0], [0]>} : vector<4x6x32xf32>, vector<4x32x24xf32>, vector<4x6x24xf32> -> vector<4x6x24xf32>
    "tpu.trace_stop"() : () -> ()
    %c0_17 = arith.constant 0 : index
    %c0_18 = arith.constant 0 : index
    %c0_19 = arith.constant 0 : index
    %37 = vector.load %arg6[%c0_17, %c0_18, %c0_19] : memref<2x4x24xf32, #tpu.memory_space<vmem>>, vector<1x4x24xf32>
    %38 = vector.shape_cast %37 : vector<1x4x24xf32> to vector<4x24xf32>
    %39 = vector.shape_cast %38 : vector<4x24xf32> to vector<4x1x24xf32>
    %40 = vector.broadcast %39 : vector<4x1x24xf32> to vector<4x6x24xf32>
    %41 = arith.addf %36, %40 : vector<4x6x24xf32>
    %42 = vector.extract_strided_slice %41 {offsets = [0, 0, 0], sizes = [4, 6, 8], strides = [1, 1, 1]} : vector<4x6x24xf32> to vector<4x6x8xf32>
    %43 = vector.extract_strided_slice %41 {offsets = [0, 0, 8], sizes = [4, 6, 8], strides = [1, 1, 1]} : vector<4x6x24xf32> to vector<4x6x8xf32>
    %44 = vector.extract_strided_slice %41 {offsets = [0, 0, 16], sizes = [4, 6, 8], strides = [1, 1, 1]} : vector<4x6x24xf32> to vector<4x6x8xf32>
    "tpu.trace_start"() <{level = 10 : i32, message = "hqd,hkd->hqk"}> : () -> ()
    %cst_20 = arith.constant dense<0.000000e+00> : vector<4x6x6xf32>
    %45 = tpu.matmul %42, %43, %cst_20 {dimension_numbers = #tpu.dot_dimension_numbers<[2], [2], [1], [1], [0, 0, 0, 1, 1, 1], [0], [0]>} : vector<4x6x8xf32>, vector<4x6x8xf32>, vector<4x6x6xf32> -> vector<4x6x6xf32>
    "tpu.trace_stop"() : () -> ()
    %cst_21 = arith.constant dense<0xFF800000> : vector<4x6xf32>
    %46 = vector.multi_reduction <maximumf>, %45, %cst_21 [2] : vector<4x6x6xf32> to vector<4x6xf32>
    %47 = vector.shape_cast %46 : vector<4x6xf32> to vector<4x6x1xf32>
    %48 = vector.broadcast %47 : vector<4x6x1xf32> to vector<4x6x6xf32>
    %49 = arith.subf %45, %48 : vector<4x6x6xf32>
    %50 = math.exp %49 : vector<4x6x6xf32>
    %cst_22 = arith.constant dense<0.000000e+00> : vector<4x6xf32>
    %51 = vector.multi_reduction <add>, %50, %cst_22 [2] : vector<4x6x6xf32> to vector<4x6xf32>
    %52 = vector.shape_cast %51 : vector<4x6xf32> to vector<4x6x1xf32>
    %53 = vector.broadcast %52 : vector<4x6x1xf32> to vector<4x6x6xf32>
    %54 = arith.divf %50, %53 : vector<4x6x6xf32>
    "tpu.trace_start"() <{level = 10 : i32, message = "hqk,hkd->hqd"}> : () -> ()
    %cst_23 = arith.constant dense<0.000000e+00> : vector<4x6x8xf32>
    %55 = tpu.matmul %54, %44, %cst_23 {dimension_numbers = #tpu.dot_dimension_numbers<[2], [1], [1], [2], [0, 0, 0, 1, 1, 2], [0], [0]>} : vector<4x6x6xf32>, vector<4x6x8xf32>, vector<4x6x8xf32> -> vector<4x6x8xf32>
    "tpu.trace_stop"() : () -> ()
    %c0_24 = arith.constant 0 : index
    %c0_25 = arith.constant 0 : index
    %c0_26 = arith.constant 0 : index
    %c0_27 = arith.constant 0 : index
    %56 = vector.load %arg7[%c0_24, %c0_25, %c0_26, %c0_27] : memref<2x4x8x32xf32, #tpu.memory_space<vmem>>, vector<1x4x8x32xf32>
    %57 = vector.shape_cast %56 : vector<1x4x8x32xf32> to vector<4x8x32xf32>
    "tpu.trace_start"() <{level = 10 : i32, message = "hqd,hdo->hqo"}> : () -> ()
    %cst_28 = arith.constant dense<0.000000e+00> : vector<4x6x32xf32>
    %58 = tpu.matmul %55, %57, %cst_28 {dimension_numbers = #tpu.dot_dimension_numbers<[2], [1], [1], [2], [0, 0, 0, 1, 1, 2], [0], [0]>} : vector<4x6x8xf32>, vector<4x8x32xf32>, vector<4x6x32xf32> -> vector<4x6x32xf32>
    "tpu.trace_stop"() : () -> ()
    %cst_29 = arith.constant dense<0.000000e+00> : vector<6x32xf32>
    %59 = vector.multi_reduction <add>, %58, %cst_29 [0] : vector<4x6x32xf32> to vector<6x32xf32>
    %c0_30 = arith.constant 0 : index
    %c0_31 = arith.constant 0 : index
    %60 = vector.load %arg8[%c0_30, %c0_31] : memref<2x32xf32, #tpu.memory_space<vmem>>, vector<1x32xf32>
    %61 = vector.shape_cast %60 : vector<1x32xf32> to vector<32xf32>
    %62 = vector.shape_cast %61 : vector<32xf32> to vector<1x32xf32>
    %63 = vector.broadcast %62 : vector<1x32xf32> to vector<6x32xf32>
    %64 = arith.addf %59, %63 : vector<6x32xf32>
    %65 = arith.addf %3, %64 : vector<6x32xf32>
    %c0_32 = arith.constant 0 : index
    %c0_33 = arith.constant 0 : index
    %66 = vector.load %arg9[%c0_32, %c0_33] : memref<2x32xf32, #tpu.memory_space<vmem>>, vector<1x32xf32>
    %67 = vector.shape_cast %66 : vector<1x32xf32> to vector<32xf32>
    %c0_34 = arith.constant 0 : index
    %c0_35 = arith.constant 0 : index
    %68 = vector.load %arg10[%c0_34, %c0_35] : memref<2x32xf32, #tpu.memory_space<vmem>>, vector<1x32xf32>
    %69 = vector.shape_cast %68 : vector<1x32xf32> to vector<32xf32>
    %cst_36 = arith.constant dense<0.000000e+00> : vector<6xf32>
    %70 = vector.multi_reduction <add>, %65, %cst_36 [1] : vector<6x32xf32> to vector<6xf32>
    %71 = vector.shape_cast %70 : vector<6xf32> to vector<6x1xf32>
    %cst_37 = arith.constant 3.200000e+01 : f32
    %72 = vector.broadcast %cst_37 : f32 to vector<6x1xf32>
    %73 = arith.divf %71, %72 : vector<6x1xf32>
    %74 = vector.broadcast %73 : vector<6x1xf32> to vector<6x32xf32>
    %75 = arith.subf %65, %74 : vector<6x32xf32>
    %76 = arith.mulf %75, %75 : vector<6x32xf32>
    %cst_38 = arith.constant dense<0.000000e+00> : vector<6xf32>
    %77 = vector.multi_reduction <add>, %76, %cst_38 [1] : vector<6x32xf32> to vector<6xf32>
    %78 = vector.shape_cast %77 : vector<6xf32> to vector<6x1xf32>
    %cst_39 = arith.constant 3.200000e+01 : f32
    %79 = vector.broadcast %cst_39 : f32 to vector<6x1xf32>
    %80 = arith.divf %78, %79 : vector<6x1xf32>
    %81 = vector.broadcast %73 : vector<6x1xf32> to vector<6x32xf32>
    %82 = arith.subf %65, %81 : vector<6x32xf32>
    %cst_40 = arith.constant 9.99999974E-6 : f32
    %83 = vector.broadcast %cst_40 : f32 to vector<6x1xf32>
    %84 = arith.addf %80, %83 : vector<6x1xf32>
    %85 = math.sqrt %84 : vector<6x1xf32>
    %86 = vector.broadcast %85 : vector<6x1xf32> to vector<6x32xf32>
    %87 = arith.divf %82, %86 : vector<6x32xf32>
    %88 = vector.shape_cast %67 : vector<32xf32> to vector<1x32xf32>
    %89 = vector.broadcast %88 : vector<1x32xf32> to vector<6x32xf32>
    %90 = arith.mulf %87, %89 : vector<6x32xf32>
    %91 = vector.shape_cast %69 : vector<32xf32> to vector<1x32xf32>
    %92 = vector.broadcast %91 : vector<1x32xf32> to vector<6x32xf32>
    %93 = arith.addf %90, %92 : vector<6x32xf32>
    %c0_41 = arith.constant 0 : index
    %c0_42 = arith.constant 0 : index
    %c0_43 = arith.constant 0 : index
    %94 = vector.load %arg11[%c0_41, %c0_42, %c0_43] : memref<2x32x128xf32, #tpu.memory_space<vmem>>, vector<1x32x128xf32>
    %95 = vector.shape_cast %94 : vector<1x32x128xf32> to vector<32x128xf32>
    %cst_44 = arith.constant dense<0.000000e+00> : vector<6x128xf32>
    %96 = tpu.matmul %93, %95, %cst_44 {dimension_numbers = #tpu.dot_dimension_numbers<[1], [0], [0], [1], [0, 0, 1, 1], [], []>} : vector<6x32xf32>, vector<32x128xf32>, vector<6x128xf32> -> vector<6x128xf32>
    %c0_45 = arith.constant 0 : index
    %c0_46 = arith.constant 0 : index
    %97 = vector.load %arg12[%c0_45, %c0_46] : memref<2x128xf32, #tpu.memory_space<vmem>>, vector<1x128xf32>
    %98 = vector.shape_cast %97 : vector<1x128xf32> to vector<128xf32>
    %99 = vector.shape_cast %98 : vector<128xf32> to vector<1x128xf32>
    %100 = vector.broadcast %99 : vector<1x128xf32> to vector<6x128xf32>
    %101 = arith.addf %96, %100 : vector<6x128xf32>
    %cst_47 = arith.constant 5.000000e-01 : f32
    %102 = vector.broadcast %cst_47 : f32 to vector<6x128xf32>
    %103 = arith.mulf %102, %101 : vector<6x128xf32>
    %cst_48 = arith.constant 0.707106769 : f32
    %104 = vector.broadcast %cst_48 : f32 to vector<6x128xf32>
    %105 = arith.mulf %101, %104 : vector<6x128xf32>
    %cst_49 = arith.constant 0.000000e+00 : f32
    %106 = vector.broadcast %cst_49 : f32 to vector<6x128xf32>
    %107 = arith.cmpf oge, %105, %106 : vector<6x128xf32>
    %cst_50 = arith.constant 1.000000e+00 : f32
    %cst_51 = arith.constant -1.000000e+00 : f32
    %108 = vector.broadcast %cst_50 : f32 to vector<6x128xf32>
    %109 = vector.broadcast %cst_51 : f32 to vector<6x128xf32>
    %110 = arith.select %107, %108, %109 : vector<6x128xi1>, vector<6x128xf32>
    %111 = math.absf %105 : vector<6x128xf32>
    %cst_52 = arith.constant 0.327591091 : f32
    %112 = vector.broadcast %cst_52 : f32 to vector<6x128xf32>
    %113 = arith.mulf %112, %111 : vector<6x128xf32>
    %cst_53 = arith.constant 1.000000e+00 : f32
    %114 = vector.broadcast %cst_53 : f32 to vector<6x128xf32>
    %115 = arith.addf %114, %113 : vector<6x128xf32>
    %cst_54 = arith.constant 1.000000e+00 : f32
    %116 = vector.broadcast %cst_54 : f32 to vector<6x128xf32>
    %117 = arith.divf %116, %115 : vector<6x128xf32>
    %cst_55 = arith.constant 1.06140542 : f32
    %118 = vector.broadcast %cst_55 : f32 to vector<6x128xf32>
    %119 = arith.mulf %118, %117 : vector<6x128xf32>
    %cst_56 = arith.constant -1.45315206 : f32
    %120 = vector.broadcast %cst_56 : f32 to vector<6x128xf32>
    %121 = arith.addf %119, %120 : vector<6x128xf32>
    %122 = arith.mulf %121, %117 : vector<6x128xf32>
    %cst_57 = arith.constant 1.42141378 : f32
    %123 = vector.broadcast %cst_57 : f32 to vector<6x128xf32>
    %124 = arith.addf %122, %123 : vector<6x128xf32>
    %125 = arith.mulf %124, %117 : vector<6x128xf32>
    %cst_58 = arith.constant -0.284496725 : f32
    %126 = vector.broadcast %cst_58 : f32 to vector<6x128xf32>
    %127 = arith.addf %125, %126 : vector<6x128xf32>
    %128 = arith.mulf %127, %117 : vector<6x128xf32>
    %cst_59 = arith.constant 0.254829586 : f32
    %129 = vector.broadcast %cst_59 : f32 to vector<6x128xf32>
    %130 = arith.addf %128, %129 : vector<6x128xf32>
    %131 = arith.mulf %130, %117 : vector<6x128xf32>
    %cst_60 = arith.constant 0.000000e+00 : f32
    %132 = vector.broadcast %cst_60 : f32 to vector<6x128xf32>
    %133 = arith.subf %132, %111 : vector<6x128xf32>
    %134 = arith.mulf %133, %111 : vector<6x128xf32>
    %135 = math.exp %134 : vector<6x128xf32>
    %136 = arith.mulf %131, %135 : vector<6x128xf32>
    %cst_61 = arith.constant 1.000000e+00 : f32
    %137 = vector.broadcast %cst_61 : f32 to vector<6x128xf32>
    %138 = arith.subf %137, %136 : vector<6x128xf32>
    %139 = arith.mulf %110, %138 : vector<6x128xf32>
    %cst_62 = arith.constant 1.000000e+00 : f32
    %140 = vector.broadcast %cst_62 : f32 to vector<6x128xf32>
    %141 = arith.addf %140, %139 : vector<6x128xf32>
    %142 = arith.mulf %103, %141 : vector<6x128xf32>
    %c0_63 = arith.constant 0 : index
    %c0_64 = arith.constant 0 : index
    %c0_65 = arith.constant 0 : index
    %143 = vector.load %arg13[%c0_63, %c0_64, %c0_65] : memref<2x128x32xf32, #tpu.memory_space<vmem>>, vector<1x128x32xf32>
    %144 = vector.shape_cast %143 : vector<1x128x32xf32> to vector<128x32xf32>
    %cst_66 = arith.constant dense<0.000000e+00> : vector<6x32xf32>
    %145 = tpu.matmul %142, %144, %cst_66 {dimension_numbers = #tpu.dot_dimension_numbers<[1], [0], [0], [1], [0, 0, 1, 1], [], []>} : vector<6x128xf32>, vector<128x32xf32>, vector<6x32xf32> -> vector<6x32xf32>
    %146 = arith.addf %65, %145 : vector<6x32xf32>
    %c0_67 = arith.constant 0 : index
    %c0_68 = arith.constant 0 : index
    %147 = vector.load %arg14[%c0_67, %c0_68] : memref<2x32xf32, #tpu.memory_space<vmem>>, vector<1x32xf32>
    %148 = vector.shape_cast %147 : vector<1x32xf32> to vector<32xf32>
    %149 = vector.shape_cast %148 : vector<32xf32> to vector<1x32xf32>
    %150 = vector.broadcast %149 : vector<1x32xf32> to vector<6x32xf32>
    %151 = arith.addf %146, %150 : vector<6x32xf32>
    %c1 = arith.constant 1 : index
    %c0_69 = arith.constant 0 : index
    %152 = vector.load %arg3[%c1, %c0_69] : memref<2x32xf32, #tpu.memory_space<vmem>>, vector<1x32xf32>
    %153 = vector.shape_cast %152 : vector<1x32xf32> to vector<32xf32>
    %c1_70 = arith.constant 1 : index
    %c0_71 = arith.constant 0 : index
    %154 = vector.load %arg4[%c1_70, %c0_71] : memref<2x32xf32, #tpu.memory_space<vmem>>, vector<1x32xf32>
    %155 = vector.shape_cast %154 : vector<1x32xf32> to vector<32xf32>
    %cst_72 = arith.constant dense<0.000000e+00> : vector<6xf32>
    %156 = vector.multi_reduction <add>, %151, %cst_72 [1] : vector<6x32xf32> to vector<6xf32>
    %157 = vector.shape_cast %156 : vector<6xf32> to vector<6x1xf32>
    %cst_73 = arith.constant 3.200000e+01 : f32
    %158 = vector.broadcast %cst_73 : f32 to vector<6x1xf32>
    %159 = arith.divf %157, %158 : vector<6x1xf32>
    %160 = vector.broadcast %159 : vector<6x1xf32> to vector<6x32xf32>
    %161 = arith.subf %151, %160 : vector<6x32xf32>
    %162 = arith.mulf %161, %161 : vector<6x32xf32>
    %cst_74 = arith.constant dense<0.000000e+00> : vector<6xf32>
    %163 = vector.multi_reduction <add>, %162, %cst_74 [1] : vector<6x32xf32> to vector<6xf32>
    %164 = vector.shape_cast %163 : vector<6xf32> to vector<6x1xf32>
    %cst_75 = arith.constant 3.200000e+01 : f32
    %165 = vector.broadcast %cst_75 : f32 to vector<6x1xf32>
    %166 = arith.divf %164, %165 : vector<6x1xf32>
    %167 = vector.broadcast %159 : vector<6x1xf32> to vector<6x32xf32>
    %168 = arith.subf %151, %167 : vector<6x32xf32>
    %cst_76 = arith.constant 9.99999974E-6 : f32
    %169 = vector.broadcast %cst_76 : f32 to vector<6x1xf32>
    %170 = arith.addf %166, %169 : vector<6x1xf32>
    %171 = math.sqrt %170 : vector<6x1xf32>
    %172 = vector.broadcast %171 : vector<6x1xf32> to vector<6x32xf32>
    %173 = arith.divf %168, %172 : vector<6x32xf32>
    %174 = vector.shape_cast %153 : vector<32xf32> to vector<1x32xf32>
    %175 = vector.broadcast %174 : vector<1x32xf32> to vector<6x32xf32>
    %176 = arith.mulf %173, %175 : vector<6x32xf32>
    %177 = vector.shape_cast %155 : vector<32xf32> to vector<1x32xf32>
    %178 = vector.broadcast %177 : vector<1x32xf32> to vector<6x32xf32>
    %179 = arith.addf %176, %178 : vector<6x32xf32>
    %180 = vector.shape_cast %179 : vector<6x32xf32> to vector<1x6x32xf32>
    %181 = vector.broadcast %180 : vector<1x6x32xf32> to vector<4x6x32xf32>
    %c1_77 = arith.constant 1 : index
    %c0_78 = arith.constant 0 : index
    %c0_79 = arith.constant 0 : index
    %c0_80 = arith.constant 0 : index
    %182 = vector.load %arg5[%c1_77, %c0_78, %c0_79, %c0_80] : memref<2x4x32x24xf32, #tpu.memory_space<vmem>>, vector<1x4x32x24xf32>
    %183 = vector.shape_cast %182 : vector<1x4x32x24xf32> to vector<4x32x24xf32>
    "tpu.trace_start"() <{level = 10 : i32, message = "hse,hef->hsf"}> : () -> ()
    %cst_81 = arith.constant dense<0.000000e+00> : vector<4x6x24xf32>
    %184 = tpu.matmul %181, %183, %cst_81 {dimension_numbers = #tpu.dot_dimension_numbers<[2], [1], [1], [2], [0, 0, 0, 1, 1, 2], [0], [0]>} : vector<4x6x32xf32>, vector<4x32x24xf32>, vector<4x6x24xf32> -> vector<4x6x24xf32>
    "tpu.trace_stop"() : () -> ()
    %c1_82 = arith.constant 1 : index
    %c0_83 = arith.constant 0 : index
    %c0_84 = arith.constant 0 : index
    %185 = vector.load %arg6[%c1_82, %c0_83, %c0_84] : memref<2x4x24xf32, #tpu.memory_space<vmem>>, vector<1x4x24xf32>
    %186 = vector.shape_cast %185 : vector<1x4x24xf32> to vector<4x24xf32>
    %187 = vector.shape_cast %186 : vector<4x24xf32> to vector<4x1x24xf32>
    %188 = vector.broadcast %187 : vector<4x1x24xf32> to vector<4x6x24xf32>
    %189 = arith.addf %184, %188 : vector<4x6x24xf32>
    %190 = vector.extract_strided_slice %189 {offsets = [0, 0, 0], sizes = [4, 6, 8], strides = [1, 1, 1]} : vector<4x6x24xf32> to vector<4x6x8xf32>
    %191 = vector.extract_strided_slice %189 {offsets = [0, 0, 8], sizes = [4, 6, 8], strides = [1, 1, 1]} : vector<4x6x24xf32> to vector<4x6x8xf32>
    %192 = vector.extract_strided_slice %189 {offsets = [0, 0, 16], sizes = [4, 6, 8], strides = [1, 1, 1]} : vector<4x6x24xf32> to vector<4x6x8xf32>
    "tpu.trace_start"() <{level = 10 : i32, message = "hqd,hkd->hqk"}> : () -> ()
    %cst_85 = arith.constant dense<0.000000e+00> : vector<4x6x6xf32>
    %193 = tpu.matmul %190, %191, %cst_85 {dimension_numbers = #tpu.dot_dimension_numbers<[2], [2], [1], [1], [0, 0, 0, 1, 1, 1], [0], [0]>} : vector<4x6x8xf32>, vector<4x6x8xf32>, vector<4x6x6xf32> -> vector<4x6x6xf32>
    "tpu.trace_stop"() : () -> ()
    %cst_86 = arith.constant dense<0xFF800000> : vector<4x6xf32>
    %194 = vector.multi_reduction <maximumf>, %193, %cst_86 [2] : vector<4x6x6xf32> to vector<4x6xf32>
    %195 = vector.shape_cast %194 : vector<4x6xf32> to vector<4x6x1xf32>
    %196 = vector.broadcast %195 : vector<4x6x1xf32> to vector<4x6x6xf32>
    %197 = arith.subf %193, %196 : vector<4x6x6xf32>
    %198 = math.exp %197 : vector<4x6x6xf32>
    %cst_87 = arith.constant dense<0.000000e+00> : vector<4x6xf32>
    %199 = vector.multi_reduction <add>, %198, %cst_87 [2] : vector<4x6x6xf32> to vector<4x6xf32>
    %200 = vector.shape_cast %199 : vector<4x6xf32> to vector<4x6x1xf32>
    %201 = vector.broadcast %200 : vector<4x6x1xf32> to vector<4x6x6xf32>
    %202 = arith.divf %198, %201 : vector<4x6x6xf32>
    "tpu.trace_start"() <{level = 10 : i32, message = "hqk,hkd->hqd"}> : () -> ()
    %cst_88 = arith.constant dense<0.000000e+00> : vector<4x6x8xf32>
    %203 = tpu.matmul %202, %192, %cst_88 {dimension_numbers = #tpu.dot_dimension_numbers<[2], [1], [1], [2], [0, 0, 0, 1, 1, 2], [0], [0]>} : vector<4x6x6xf32>, vector<4x6x8xf32>, vector<4x6x8xf32> -> vector<4x6x8xf32>
    "tpu.trace_stop"() : () -> ()
    %c1_89 = arith.constant 1 : index
    %c0_90 = arith.constant 0 : index
    %c0_91 = arith.constant 0 : index
    %c0_92 = arith.constant 0 : index
    %204 = vector.load %arg7[%c1_89, %c0_90, %c0_91, %c0_92] : memref<2x4x8x32xf32, #tpu.memory_space<vmem>>, vector<1x4x8x32xf32>
    %205 = vector.shape_cast %204 : vector<1x4x8x32xf32> to vector<4x8x32xf32>
    "tpu.trace_start"() <{level = 10 : i32, message = "hqd,hdo->hqo"}> : () -> ()
    %cst_93 = arith.constant dense<0.000000e+00> : vector<4x6x32xf32>
    %206 = tpu.matmul %203, %205, %cst_93 {dimension_numbers = #tpu.dot_dimension_numbers<[2], [1], [1], [2], [0, 0, 0, 1, 1, 2], [0], [0]>} : vector<4x6x8xf32>, vector<4x8x32xf32>, vector<4x6x32xf32> -> vector<4x6x32xf32>
    "tpu.trace_stop"() : () -> ()
    %cst_94 = arith.constant dense<0.000000e+00> : vector<6x32xf32>
    %207 = vector.multi_reduction <add>, %206, %cst_94 [0] : vector<4x6x32xf32> to vector<6x32xf32>
    %c1_95 = arith.constant 1 : index
    %c0_96 = arith.constant 0 : index
    %208 = vector.load %arg8[%c1_95, %c0_96] : memref<2x32xf32, #tpu.memory_space<vmem>>, vector<1x32xf32>
    %209 = vector.shape_cast %208 : vector<1x32xf32> to vector<32xf32>
    %210 = vector.shape_cast %209 : vector<32xf32> to vector<1x32xf32>
    %211 = vector.broadcast %210 : vector<1x32xf32> to vector<6x32xf32>
    %212 = arith.addf %207, %211 : vector<6x32xf32>
    %213 = arith.addf %151, %212 : vector<6x32xf32>
    %c1_97 = arith.constant 1 : index
    %c0_98 = arith.constant 0 : index
    %214 = vector.load %arg9[%c1_97, %c0_98] : memref<2x32xf32, #tpu.memory_space<vmem>>, vector<1x32xf32>
    %215 = vector.shape_cast %214 : vector<1x32xf32> to vector<32xf32>
    %c1_99 = arith.constant 1 : index
    %c0_100 = arith.constant 0 : index
    %216 = vector.load %arg10[%c1_99, %c0_100] : memref<2x32xf32, #tpu.memory_space<vmem>>, vector<1x32xf32>
    %217 = vector.shape_cast %216 : vector<1x32xf32> to vector<32xf32>
    %cst_101 = arith.constant dense<0.000000e+00> : vector<6xf32>
    %218 = vector.multi_reduction <add>, %213, %cst_101 [1] : vector<6x32xf32> to vector<6xf32>
    %219 = vector.shape_cast %218 : vector<6xf32> to vector<6x1xf32>
    %cst_102 = arith.constant 3.200000e+01 : f32
    %220 = vector.broadcast %cst_102 : f32 to vector<6x1xf32>
    %221 = arith.divf %219, %220 : vector<6x1xf32>
    %222 = vector.broadcast %221 : vector<6x1xf32> to vector<6x32xf32>
    %223 = arith.subf %213, %222 : vector<6x32xf32>
    %224 = arith.mulf %223, %223 : vector<6x32xf32>
    %cst_103 = arith.constant dense<0.000000e+00> : vector<6xf32>
    %225 = vector.multi_reduction <add>, %224, %cst_103 [1] : vector<6x32xf32> to vector<6xf32>
    %226 = vector.shape_cast %225 : vector<6xf32> to vector<6x1xf32>
    %cst_104 = arith.constant 3.200000e+01 : f32
    %227 = vector.broadcast %cst_104 : f32 to vector<6x1xf32>
    %228 = arith.divf %226, %227 : vector<6x1xf32>
    %229 = vector.broadcast %221 : vector<6x1xf32> to vector<6x32xf32>
    %230 = arith.subf %213, %229 : vector<6x32xf32>
    %cst_105 = arith.constant 9.99999974E-6 : f32
    %231 = vector.broadcast %cst_105 : f32 to vector<6x1xf32>
    %232 = arith.addf %228, %231 : vector<6x1xf32>
    %233 = math.sqrt %232 : vector<6x1xf32>
    %234 = vector.broadcast %233 : vector<6x1xf32> to vector<6x32xf32>
    %235 = arith.divf %230, %234 : vector<6x32xf32>
    %236 = vector.shape_cast %215 : vector<32xf32> to vector<1x32xf32>
    %237 = vector.broadcast %236 : vector<1x32xf32> to vector<6x32xf32>
    %238 = arith.mulf %235, %237 : vector<6x32xf32>
    %239 = vector.shape_cast %217 : vector<32xf32> to vector<1x32xf32>
    %240 = vector.broadcast %239 : vector<1x32xf32> to vector<6x32xf32>
    %241 = arith.addf %238, %240 : vector<6x32xf32>
    %c1_106 = arith.constant 1 : index
    %c0_107 = arith.constant 0 : index
    %c0_108 = arith.constant 0 : index
    %242 = vector.load %arg11[%c1_106, %c0_107, %c0_108] : memref<2x32x128xf32, #tpu.memory_space<vmem>>, vector<1x32x128xf32>
    %243 = vector.shape_cast %242 : vector<1x32x128xf32> to vector<32x128xf32>
    %cst_109 = arith.constant dense<0.000000e+00> : vector<6x128xf32>
    %244 = tpu.matmul %241, %243, %cst_109 {dimension_numbers = #tpu.dot_dimension_numbers<[1], [0], [0], [1], [0, 0, 1, 1], [], []>} : vector<6x32xf32>, vector<32x128xf32>, vector<6x128xf32> -> vector<6x128xf32>
    %c1_110 = arith.constant 1 : index
    %c0_111 = arith.constant 0 : index
    %245 = vector.load %arg12[%c1_110, %c0_111] : memref<2x128xf32, #tpu.memory_space<vmem>>, vector<1x128xf32>
    %246 = vector.shape_cast %245 : vector<1x128xf32> to vector<128xf32>
    %247 = vector.shape_cast %246 : vector<128xf32> to vector<1x128xf32>
    %248 = vector.broadcast %247 : vector<1x128xf32> to vector<6x128xf32>
    %249 = arith.addf %244, %248 : vector<6x128xf32>
    %cst_112 = arith.constant 5.000000e-01 : f32
    %250 = vector.broadcast %cst_112 : f32 to vector<6x128xf32>
    %251 = arith.mulf %250, %249 : vector<6x128xf32>
    %cst_113 = arith.constant 0.707106769 : f32
    %252 = vector.broadcast %cst_113 : f32 to vector<6x128xf32>
    %253 = arith.mulf %249, %252 : vector<6x128xf32>
    %cst_114 = arith.constant 0.000000e+00 : f32
    %254 = vector.broadcast %cst_114 : f32 to vector<6x128xf32>
    %255 = arith.cmpf oge, %253, %254 : vector<6x128xf32>
    %cst_115 = arith.constant 1.000000e+00 : f32
    %cst_116 = arith.constant -1.000000e+00 : f32
    %256 = vector.broadcast %cst_115 : f32 to vector<6x128xf32>
    %257 = vector.broadcast %cst_116 : f32 to vector<6x128xf32>
    %258 = arith.select %255, %256, %257 : vector<6x128xi1>, vector<6x128xf32>
    %259 = math.absf %253 : vector<6x128xf32>
    %cst_117 = arith.constant 0.327591091 : f32
    %260 = vector.broadcast %cst_117 : f32 to vector<6x128xf32>
    %261 = arith.mulf %260, %259 : vector<6x128xf32>
    %cst_118 = arith.constant 1.000000e+00 : f32
    %262 = vector.broadcast %cst_118 : f32 to vector<6x128xf32>
    %263 = arith.addf %262, %261 : vector<6x128xf32>
    %cst_119 = arith.constant 1.000000e+00 : f32
    %264 = vector.broadcast %cst_119 : f32 to vector<6x128xf32>
    %265 = arith.divf %264, %263 : vector<6x128xf32>
    %cst_120 = arith.constant 1.06140542 : f32
    %266 = vector.broadcast %cst_120 : f32 to vector<6x128xf32>
    %267 = arith.mulf %266, %265 : vector<6x128xf32>
    %cst_121 = arith.constant -1.45315206 : f32
    %268 = vector.broadcast %cst_121 : f32 to vector<6x128xf32>
    %269 = arith.addf %267, %268 : vector<6x128xf32>
    %270 = arith.mulf %269, %265 : vector<6x128xf32>
    %cst_122 = arith.constant 1.42141378 : f32
    %271 = vector.broadcast %cst_122 : f32 to vector<6x128xf32>
    %272 = arith.addf %270, %271 : vector<6x128xf32>
    %273 = arith.mulf %272, %265 : vector<6x128xf32>
    %cst_123 = arith.constant -0.284496725 : f32
    %274 = vector.broadcast %cst_123 : f32 to vector<6x128xf32>
    %275 = arith.addf %273, %274 : vector<6x128xf32>
    %276 = arith.mulf %275, %265 : vector<6x128xf32>
    %cst_124 = arith.constant 0.254829586 : f32
    %277 = vector.broadcast %cst_124 : f32 to vector<6x128xf32>
    %278 = arith.addf %276, %277 : vector<6x128xf32>
    %279 = arith.mulf %278, %265 : vector<6x128xf32>
    %cst_125 = arith.constant 0.000000e+00 : f32
    %280 = vector.broadcast %cst_125 : f32 to vector<6x128xf32>
    %281 = arith.subf %280, %259 : vector<6x128xf32>
    %282 = arith.mulf %281, %259 : vector<6x128xf32>
    %283 = math.exp %282 : vector<6x128xf32>
    %284 = arith.mulf %279, %283 : vector<6x128xf32>
    %cst_126 = arith.constant 1.000000e+00 : f32
    %285 = vector.broadcast %cst_126 : f32 to vector<6x128xf32>
    %286 = arith.subf %285, %284 : vector<6x128xf32>
    %287 = arith.mulf %258, %286 : vector<6x128xf32>
    %cst_127 = arith.constant 1.000000e+00 : f32
    %288 = vector.broadcast %cst_127 : f32 to vector<6x128xf32>
    %289 = arith.addf %288, %287 : vector<6x128xf32>
    %290 = arith.mulf %251, %289 : vector<6x128xf32>
    %c1_128 = arith.constant 1 : index
    %c0_129 = arith.constant 0 : index
    %c0_130 = arith.constant 0 : index
    %291 = vector.load %arg13[%c1_128, %c0_129, %c0_130] : memref<2x128x32xf32, #tpu.memory_space<vmem>>, vector<1x128x32xf32>
    %292 = vector.shape_cast %291 : vector<1x128x32xf32> to vector<128x32xf32>
    %cst_131 = arith.constant dense<0.000000e+00> : vector<6x32xf32>
    %293 = tpu.matmul %290, %292, %cst_131 {dimension_numbers = #tpu.dot_dimension_numbers<[1], [0], [0], [1], [0, 0, 1, 1], [], []>} : vector<6x128xf32>, vector<128x32xf32>, vector<6x32xf32> -> vector<6x32xf32>
    %294 = arith.addf %213, %293 : vector<6x32xf32>
    %c1_132 = arith.constant 1 : index
    %c0_133 = arith.constant 0 : index
    %295 = vector.load %arg14[%c1_132, %c0_133] : memref<2x32xf32, #tpu.memory_space<vmem>>, vector<1x32xf32>
    %296 = vector.shape_cast %295 : vector<1x32xf32> to vector<32xf32>
    %297 = vector.shape_cast %296 : vector<32xf32> to vector<1x32xf32>
    %298 = vector.broadcast %297 : vector<1x32xf32> to vector<6x32xf32>
    %299 = arith.addf %294, %298 : vector<6x32xf32>
    %c0_134 = arith.constant 0 : index
    %c0_135 = arith.constant 0 : index
    %c0_136 = arith.constant 0 : index
    %300 = vector.load %arg15[%c0_134, %c0_135, %c0_136] : memref<6x32x32xf32, #tpu.memory_space<vmem>>, vector<6x32x32xf32>
    %c0_137 = arith.constant 0 : index
    %c0_138 = arith.constant 0 : index
    %301 = vector.load %arg16[%c0_137, %c0_138] : memref<1x32xf32, #tpu.memory_space<vmem>>, vector<1x32xf32>
    %302 = vector.shape_cast %299 : vector<6x32xf32> to vector<6x1x32xf32>
    "tpu.trace_start"() <{level = 10 : i32, message = "sxe,seo->sxo"}> : () -> ()
    %cst_139 = arith.constant dense<0.000000e+00> : vector<6x1x32xf32>
    %303 = tpu.matmul %302, %300, %cst_139 {dimension_numbers = #tpu.dot_dimension_numbers<[2], [1], [1], [2], [0, 0, 0, 1, 1, 2], [0], [0]>} : vector<6x1x32xf32>, vector<6x32x32xf32>, vector<6x1x32xf32> -> vector<6x1x32xf32>
    "tpu.trace_stop"() : () -> ()
    %cst_140 = arith.constant dense<0.000000e+00> : vector<1x32xf32>
    %304 = vector.multi_reduction <add>, %303, %cst_140 [0] : vector<6x1x32xf32> to vector<1x32xf32>
    %305 = arith.addf %304, %301 : vector<1x32xf32>
    %cst_141 = arith.constant 0.000000e+00 : f32
    %306 = vector.broadcast %cst_141 : f32 to vector<1x32xf32>
    %307 = arith.maximumf %305, %306 : vector<1x32xf32>
    %c0_142 = arith.constant 0 : index
    %c0_143 = arith.constant 0 : index
    %308 = vector.load %arg17[%c0_142, %c0_143] : memref<32x32xf32, #tpu.memory_space<vmem>>, vector<32x32xf32>
    %c0_144 = arith.constant 0 : index
    %c0_145 = arith.constant 0 : index
    %309 = vector.load %arg18[%c0_144, %c0_145] : memref<1x32xf32, #tpu.memory_space<vmem>>, vector<1x32xf32>
    %cst_146 = arith.constant dense<0.000000e+00> : vector<1x32xf32>
    %310 = tpu.matmul %307, %308, %cst_146 {dimension_numbers = #tpu.dot_dimension_numbers<[1], [0], [0], [1], [0, 0, 1, 1], [], []>} : vector<1x32xf32>, vector<32x32xf32>, vector<1x32xf32> -> vector<1x32xf32>
    %311 = arith.addf %310, %309 : vector<1x32xf32>
    %cst_147 = arith.constant 0.000000e+00 : f32
    %312 = vector.broadcast %cst_147 : f32 to vector<1x32xf32>
    %313 = arith.maximumf %311, %312 : vector<1x32xf32>
    %c0_148 = arith.constant 0 : index
    %c0_149 = arith.constant 0 : index
    %314 = vector.load %arg19[%c0_148, %c0_149] : memref<32x16xf32, #tpu.memory_space<vmem>>, vector<32x16xf32>
    %c0_150 = arith.constant 0 : index
    %c0_151 = arith.constant 0 : index
    %315 = vector.load %arg20[%c0_150, %c0_151] : memref<1x16xf32, #tpu.memory_space<vmem>>, vector<1x16xf32>
    %cst_152 = arith.constant dense<0.000000e+00> : vector<1x16xf32>
    %316 = tpu.matmul %313, %314, %cst_152 {dimension_numbers = #tpu.dot_dimension_numbers<[1], [0], [0], [1], [0, 0, 1, 1], [], []>} : vector<1x32xf32>, vector<32x16xf32>, vector<1x16xf32> -> vector<1x16xf32>
    %317 = arith.addf %316, %315 : vector<1x16xf32>
    %cst_153 = arith.constant 0.000000e+00 : f32
    %318 = vector.broadcast %cst_153 : f32 to vector<1x16xf32>
    %319 = arith.maximumf %317, %318 : vector<1x16xf32>
    %c0_154 = arith.constant 0 : index
    %c0_155 = arith.constant 0 : index
    %320 = vector.load %arg21[%c0_154, %c0_155] : memref<16x8xf32, #tpu.memory_space<vmem>>, vector<16x8xf32>
    %c0_156 = arith.constant 0 : index
    %c0_157 = arith.constant 0 : index
    %321 = vector.load %arg22[%c0_156, %c0_157] : memref<1x8xf32, #tpu.memory_space<vmem>>, vector<1x8xf32>
    %cst_158 = arith.constant dense<0.000000e+00> : vector<1x8xf32>
    %322 = tpu.matmul %319, %320, %cst_158 {dimension_numbers = #tpu.dot_dimension_numbers<[1], [0], [0], [1], [0, 0, 1, 1], [], []>} : vector<1x16xf32>, vector<16x8xf32>, vector<1x8xf32> -> vector<1x8xf32>
    %323 = arith.addf %322, %321 : vector<1x8xf32>
    %cst_159 = arith.constant 0.000000e+00 : f32
    %324 = vector.broadcast %cst_159 : f32 to vector<1x8xf32>
    %325 = arith.maximumf %323, %324 : vector<1x8xf32>
    %326 = vector.shape_cast %325 : vector<1x8xf32> to vector<1x1x8xf32>
    %c0_160 = arith.constant 0 : index
    %c0_161 = arith.constant 0 : index
    %c0_162 = arith.constant 0 : index
    %327 = vector.load %arg23[%c0_160, %c0_161, %c0_162] : memref<1x1x8xf32, #tpu.memory_space<vmem>>, vector<1x1x8xf32>
    tpu.vector_store %arg23[%c0_160, %c0_161, %c0_162], %326 {strides = array<i32>} : memref<1x1x8xf32, #tpu.memory_space<vmem>>, vector<1x1x8xf32>,
    return
  }
  func.func @transform_0(%arg0: i32) -> (i32, i32, i32) {
    %c0_i32 = arith.constant 0 : i32
    %c0_i32_0 = arith.constant 0 : i32
    %c0_i32_1 = arith.constant 0 : i32
    return %arg0, %c0_i32, %c0_i32_0 : i32, i32, i32
  }
  func.func @transform_1(%arg0: i32) -> (i32, i32) {
    %c0_i32 = arith.constant 0 : i32
    %c0_i32_0 = arith.constant 0 : i32
    %c0_i32_1 = arith.constant 0 : i32
    return %c0_i32, %c0_i32_0 : i32, i32
  }
  func.func @transform_2(%arg0: i32) -> (i32, i32) {
    %c0_i32 = arith.constant 0 : i32
    %c0_i32_0 = arith.constant 0 : i32
    %c0_i32_1 = arith.constant 0 : i32
    return %c0_i32, %c0_i32_0 : i32, i32
  }
  func.func @transform_3(%arg0: i32) -> (i32, i32) {
    %c0_i32 = arith.constant 0 : i32
    %c0_i32_0 = arith.constant 0 : i32
    %c0_i32_1 = arith.constant 0 : i32
    return %c0_i32, %c0_i32_0 : i32, i32
  }
  func.func @transform_4(%arg0: i32) -> (i32, i32, i32, i32) {
    %c0_i32 = arith.constant 0 : i32
    %c0_i32_0 = arith.constant 0 : i32
    %c0_i32_1 = arith.constant 0 : i32
    %c0_i32_2 = arith.constant 0 : i32
    %c0_i32_3 = arith.constant 0 : i32
    return %c0_i32, %c0_i32_0, %c0_i32_1, %c0_i32_2 : i32, i32, i32, i32
  }
  func.func @transform_5(%arg0: i32) -> (i32, i32, i32) {
    %c0_i32 = arith.constant 0 : i32
    %c0_i32_0 = arith.constant 0 : i32
    %c0_i32_1 = arith.constant 0 : i32
    %c0_i32_2 = arith.constant 0 : i32
    return %c0_i32, %c0_i32_0, %c0_i32_1 : i32, i32, i32
  }
  func.func @transform_6(%arg0: i32) -> (i32, i32, i32, i32) {
    %c0_i32 = arith.constant 0 : i32
    %c0_i32_0 = arith.constant 0 : i32
    %c0_i32_1 = arith.constant 0 : i32
    %c0_i32_2 = arith.constant 0 : i32
    %c0_i32_3 = arith.constant 0 : i32
    return %c0_i32, %c0_i32_0, %c0_i32_1, %c0_i32_2 : i32, i32, i32, i32
  }
  func.func @transform_7(%arg0: i32) -> (i32, i32) {
    %c0_i32 = arith.constant 0 : i32
    %c0_i32_0 = arith.constant 0 : i32
    %c0_i32_1 = arith.constant 0 : i32
    return %c0_i32, %c0_i32_0 : i32, i32
  }
  func.func @transform_8(%arg0: i32) -> (i32, i32) {
    %c0_i32 = arith.constant 0 : i32
    %c0_i32_0 = arith.constant 0 : i32
    %c0_i32_1 = arith.constant 0 : i32
    return %c0_i32, %c0_i32_0 : i32, i32
  }
  func.func @transform_9(%arg0: i32) -> (i32, i32) {
    %c0_i32 = arith.constant 0 : i32
    %c0_i32_0 = arith.constant 0 : i32
    %c0_i32_1 = arith.constant 0 : i32
    return %c0_i32, %c0_i32_0 : i32, i32
  }
  func.func @transform_10(%arg0: i32) -> (i32, i32, i32) {
    %c0_i32 = arith.constant 0 : i32
    %c0_i32_0 = arith.constant 0 : i32
    %c0_i32_1 = arith.constant 0 : i32
    %c0_i32_2 = arith.constant 0 : i32
    return %c0_i32, %c0_i32_0, %c0_i32_1 : i32, i32, i32
  }
  func.func @transform_11(%arg0: i32) -> (i32, i32) {
    %c0_i32 = arith.constant 0 : i32
    %c0_i32_0 = arith.constant 0 : i32
    %c0_i32_1 = arith.constant 0 : i32
    return %c0_i32, %c0_i32_0 : i32, i32
  }
  func.func @transform_12(%arg0: i32) -> (i32, i32, i32) {
    %c0_i32 = arith.constant 0 : i32
    %c0_i32_0 = arith.constant 0 : i32
    %c0_i32_1 = arith.constant 0 : i32
    %c0_i32_2 = arith.constant 0 : i32
    return %c0_i32, %c0_i32_0, %c0_i32_1 : i32, i32, i32
  }
  func.func @transform_13(%arg0: i32) -> (i32, i32) {
    %c0_i32 = arith.constant 0 : i32
    %c0_i32_0 = arith.constant 0 : i32
    %c0_i32_1 = arith.constant 0 : i32
    return %c0_i32, %c0_i32_0 : i32, i32
  }
  func.func @transform_14(%arg0: i32) -> (i32, i32, i32) {
    %c0_i32 = arith.constant 0 : i32
    %c0_i32_0 = arith.constant 0 : i32
    %c0_i32_1 = arith.constant 0 : i32
    %c0_i32_2 = arith.constant 0 : i32
    return %c0_i32, %c0_i32_0, %c0_i32_1 : i32, i32, i32
  }
  func.func @transform_15(%arg0: i32) -> (i32, i32) {
    %c0_i32 = arith.constant 0 : i32
    %c0_i32_0 = arith.constant 0 : i32
    %c0_i32_1 = arith.constant 0 : i32
    return %c0_i32, %c0_i32_0 : i32, i32
  }
  func.func @transform_16(%arg0: i32) -> (i32, i32) {
    %c0_i32 = arith.constant 0 : i32
    %c0_i32_0 = arith.constant 0 : i32
    %c0_i32_1 = arith.constant 0 : i32
    return %c0_i32, %c0_i32_0 : i32, i32
  }
  func.func @transform_17(%arg0: i32) -> (i32, i32) {
    %c0_i32 = arith.constant 0 : i32
    %c0_i32_0 = arith.constant 0 : i32
    %c0_i32_1 = arith.constant 0 : i32
    return %c0_i32, %c0_i32_0 : i32, i32
  }
  func.func @transform_18(%arg0: i32) -> (i32, i32) {
    %c0_i32 = arith.constant 0 : i32
    %c0_i32_0 = arith.constant 0 : i32
    %c0_i32_1 = arith.constant 0 : i32
    return %c0_i32, %c0_i32_0 : i32, i32
  }
  func.func @transform_19(%arg0: i32) -> (i32, i32) {
    %c0_i32 = arith.constant 0 : i32
    %c0_i32_0 = arith.constant 0 : i32
    %c0_i32_1 = arith.constant 0 : i32
    return %c0_i32, %c0_i32_0 : i32, i32
  }
  func.func @transform_20(%arg0: i32) -> (i32, i32) {
    %c0_i32 = arith.constant 0 : i32
    %c0_i32_0 = arith.constant 0 : i32
    %c0_i32_1 = arith.constant 0 : i32
    return %c0_i32, %c0_i32_0 : i32, i32
  }
  func.func @transform_21(%arg0: i32) -> (i32, i32) {
    %c0_i32 = arith.constant 0 : i32
    %c0_i32_0 = arith.constant 0 : i32
    %c0_i32_1 = arith.constant 0 : i32
    return %c0_i32, %c0_i32_0 : i32, i32
  }
  func.func @transform_22(%arg0: i32) -> (i32, i32, i32) {
    %c0_i32 = arith.constant 0 : i32
    %c0_i32_0 = arith.constant 0 : i32
    %c0_i32_1 = arith.constant 0 : i32
    return %arg0, %c0_i32, %c0_i32_0 : i32, i32, i32
  }
}

</mosaic_0001>

<bundles_post_ra>
// kernel: multi_layer_decoder.1
= control target key start
LH: loop header
LB: loop body
LE: loop exit
PB: predicated region body
PF: predicated region fallthrough
CT: control target
= control target key end

     0   :  { %s6670_s0 = inlined_call_operand.vmem [shape: f32[2,6,32], index: 0, kind: input, shape index: {}]   ;;  %s6671_s1 = inlined_call_operand.vmem [shape: f32[6,32], index: 1, kind: input, shape index: {}]   ;;  %s6672_s2 = inlined_call_operand.vmem [shape: f32[2,32], index: 2, kind: input, shape index: {}]   ;;  %s6673_s3 = inlined_call_operand.vmem [shape: f32[2,32], index: 3, kind: input, shape index: {}]   ;;  %s6674_s4 = inlined_call_operand.vmem [shape: f32[2,4,32,24], index: 4, kind: input, shape index: {}]   ;;  %s6675_s5 = inlined_call_operand.vmem [shape: f32[2,4,24], index: 5, kind: input, shape index: {}]   ;;  %s6676_s6 = inlined_call_operand.vmem [shape: f32[2,4,8,32], index: 6, kind: input, shape index: {}]   ;;  %s6677_s7 = inlined_call_operand.vmem [shape: f32[2,32], index: 7, kind: input, shape index: {}]   ;;  %s6678_s8 = inlined_call_operand.vmem [shape: f32[2,32], index: 8, kind: input, shape index: {}]   ;;  %s6679_s9 = inlined_call_operand.vmem [shape: f32[2,32], index: 9, kind: input, shape index: {}]   ;;  %s6680_s10 = inlined_call_operand.vmem [shape: f32[2,32,128], index: 10, kind: input, shape index: {}]   ;;  %s6681_s11 = inlined_call_operand.vmem [shape: f32[2,128], index: 11, kind: input, shape index: {}]   ;;  %s6682_s12 = inlined_call_operand.vmem [shape: f32[2,128,32], index: 12, kind: input, shape index: {}]   ;;  %s6683_s13 = inlined_call_operand.vmem [shape: f32[2,32], index: 13, kind: input, shape index: {}]   ;;  %s6684_s14 = inlined_call_operand.vmem [shape: f32[6,32,32], index: 14, kind: input, shape index: {}]   ;;  %s6685_s15 = inlined_call_operand.vmem [shape: f32[1,32], index: 15, kind: input, shape index: {}]   ;;  %s6686_s16 = inlined_call_operand.vmem [shape: f32[32,32], index: 16, kind: input, shape index: {}]   ;;  %s6687_s17 = inlined_call_operand.vmem [shape: f32[1,32], index: 17, kind: input, shape index: {}]   ;;  %s6688_s18 = inlined_call_operand.vmem [shape: f32[32,16], index: 18, kind: input, shape index: {}]   ;;  %s6689_s19 = inlined_call_operand.vmem [shape: f32[1,16], index: 19, kind: input, shape index: {}]   ;;  %s6690_s20 = inlined_call_operand.vmem [shape: f32[16,8], index: 20, kind: input, shape index: {}]   ;;  %s6691_s21 = inlined_call_operand.vmem [shape: f32[1,8], index: 21, kind: input, shape index: {}]   ;;  %s6692_s22 = inlined_call_operand.hbm [shape: f32[2,1,8], index: 22, kind: output, shape index: {}]  }
   0x1   :  { %6714 = sst [smem:[#allocation12_spill]] %s6670_s0 }
   0x2   :  { %6715 = sst [smem:[#allocation13_spill]] %s6671_s1 }
   0x3   :  { %6716 = sst [smem:[#allocation14_spill]] %s6672_s2 }
   0x4   :  { %6717 = sst [smem:[#allocation15_spill]] %s6673_s3 }
   0x5   :  { %6718 = sst [smem:[#allocation16_spill]] %s6674_s4 }
   0x6   :  { %6719 = sst [smem:[#allocation17_spill]] %s6675_s5 }
   0x7   :  { %6720 = sst [smem:[#allocation18_spill]] %s6676_s6 }
   0x8   :  { %6721 = sst [smem:[#allocation19_spill]] %s6691_s21 }
   0x9   :  { %6722 = sst [smem:[#allocation20_spill]] %s6692_s22 }
   0xa   :  { %27 = vsyncpa [#allocation3], 0 }
   0xb   :  { %29 = vsyncpa [#allocation3 + $0x1], 0  ;;  %s5822_s3 = smov 0   ;;  %s5824_s28 = smov 0  }
   0xc   :  { %s5826_s29 = smov 0   ;;  %s5828_s30 = smov 0  }
   0xd LB: > { %6723 = sst [smem:[#allocation5_spill]] %s5685_s3  ;;  %s5843_s4 = sadd.s32 4294967295, %s5697_s30   ;;  %s5697_s30 = sphi %s5828_s30, %s6748_s30   ;;  %s5693_s29 = sphi %s5826_s29, %s6753_s29   ;;  %s5689_s28 = sphi %s5824_s28, %s6752_s28   ;;  %s5685_s3 = sphi %s5822_s3, %s6751_s3  }
   0xe   : > { %6724 = sst [smem:[#allocation6_spill]] %s5693_s29  ;;  %s4680_s0 = sadd.s32 4294967294, %s5697_s30  }
   0xf   : > { %6725 = sst [smem:[#allocation7_spill]] %s5697_s30  ;;  %s5847_s23 = sadd.s32 1, %s5697_s30  }
  0x10   : > { %6726 = sst [smem:[#allocation8_spill]] %s5847_s23  ;;  %s509_s1 = sadd.s32 1, %s5693_s29 }
  0x11   : > { %s506_s5 = ssub.s32 %s5697_s30, %s5847_s23  ;;  %p519_p0 = scmp.ne.s32.totalorder %s5693_s29, %s5689_s28 }
  0x12   : > { %p507_p1 = scmp.eq.s32.totalorder %s506_s5, 0  ;;  %p520_p2 = scmp.eq.s32.totalorder %s5843_s4, 1 }
  0x13   : > { %p525_p3 = scmp.ne.s32.totalorder %s5689_s28, %s5685_s3  ;;  %p526_p4 = scmp.eq.s32.totalorder %s4680_s0, 1 }
  0x14   : > { %s5858_s24 = scalar_select %p507_p1, %s5693_s29, %s509_s1  }
  0x15   : > { %p5860_p5 = por %p520_p2, %p519_p0  ;;  %p5864_p6 = por %p526_p4, %p525_p3 }
  0x16   : > { %6727 = sst [smem:[#allocation9_spill]] %s5858_s24  ;;  %p4683_p7 = scmp.ge.s32.totalorder %s5697_s30, 1 }
  0x17   : > { %s6728_s6 = scalar_select %p5860_p5, 1, 0 }
  0x18   : > { %s6730_s25 = scalar_select %p5864_p6, 1, 0 }
  0x19   : > { %6729 = sst [smem:[#allocation10_spill]] %s6728_s6  ;;  %p614_p8 = scmp.lt.s32.totalorder %s5697_s30, 3 }
  0x1a   : > { %6731 = sst [smem:[#allocation11_spill]] %s6730_s25 }
  0x1b   : > { %p615_p9 = pnand %p4683_p7, %p614_p8 }
  0x1c   : > { %p674_p10 = scmp.lt.s32.totalorder (!%p615_p9), %s5843_s4, 1  ;;  %s6732_s1 = sld [smem:[#allocation13_spill]] (!%p615_p9)  ;;  %vm683_vm0 = vcmask (!%p615_p9), 259072   ;;  %v5699_v12 = vmov (!%p615_p9), 0.0|0.0   ;;  %vm5700_vm1 = vmmov (!%p615_p9), 0   ;;  %v5701_v20 = vmov (!%p615_p9), 0.0  }
  0x1d   : > { %618 = sbr.rel (%p615_p9) target bundleno = 5840 (0x16d0), region = 108  ;;  %s6733_s29 = sld [smem:[#allocation12_spill]] (!%p615_p9)  ;;  %5374 = vmatprep.subr.bf16.mxu0 (!%p615_p9), %v5699_v12  ;;  %5380 = vmatprep.subr.bf16.mxu1 (!%p615_p9), %v5699_v12  ;;  %vm777_vm4 = vcmask (!%p615_p9), 261120   ;;  %v5702_v49 = vmov (!%p615_p9), 1966171168   ;;  %v744_v51 = vlaneseq (!%p615_p9)  ;;  %vm1064_vm5 = vcmask (!%p615_p9), 64512  }
  0x1e   : > { %s6734_s24 = sld [smem:[#allocation16_spill]] (!%p615_p9)  ;;  %4987 = vmatprep.mubr.msk.f32.mxu0 (!%p615_p9), %vm5700_vm1, %v5701_v20  ;;  %4998 = vmatprep.mubr.msk.f32.mxu1 (!%p615_p9), %vm5700_vm1, %v5701_v20  ;;  %s6736_s25 = sld [smem:[#allocation15_spill]] (!%p615_p9)  ;;  %v742_v50 = vunpack.c.l.s4 (!%p615_p9), %v5702_v49  ;;  %vm1370_vm6 = vcmask (!%p615_p9), 46080   ;;  %vm1421_vm7 = vcmask (!%p615_p9), 1045504   ;;  %vm1417_vm8 = vcmask (!%p615_p9), 48128  }
  0x1f   : > { %v745_v53 = vshrl.u32 (!%p615_p9), %v744_v51, 7  ;;  %s6737_s5 = sld [smem:[#allocation17_spill]] (!%p615_p9)  ;;  %s6705_s27 = smov (!%p615_p9), 112  }
  0x20   : > { %v743_v52 = vunpack.c.0.s8 (!%p615_p9), %v742_v50  ;;  %s6738_s30 = sld [smem:[#allocation18_spill]] (!%p615_p9)  ;;  %s6741_s22 = smov (!%p615_p9), 112  }
  0x21   : > { %v5970_v57 = vsub.s32 (!%p615_p9), 0, %v745_v53 }
  0x22   : > { %v679_v0 = vld [vmem:[%s6732_s1] sm:$0x3f] (!%p615_p9)  ;;  %s6735_s1 = sld [smem:[#allocation14_spill]] (!%p615_p9)  ;;  %v5964_v54 = vsub.s32 (!%p615_p9), %v743_v52, %v745_v53 }
  0x24   : > { %s675_s26 = scalar_select %p674_p10, %s5843_s4, 1  ;;  %v715_v9 = vld [vmem:[%s6734_s24] sm:$0xff]  ;;  %v716_v10 = vld [vmem:[%s6734_s24 + $0x8] sm:$0xff]  ;;  %v717_v15 = vld [vmem:[%s6734_s24 + $0x10] sm:$0xff] }
  0x25   : > { %v719_v11 = vld [vmem:[%s6734_s24 + $0x20] sm:$0xff]  ;;  %v5375_v13 = vpack.c.bf16 %v716_v10, %v715_v9  ;;  %v720_v14 = vld [vmem:[%s6734_s24 + $0x28] sm:$0xff]  ;;  %v718_v16 = vld [vmem:[%s6734_s24 + $0x18] sm:$0xff] }
  0x26   : > { %s4684_s2 = sshll.u32 %s675_s26, 3  ;;  %v5381_v17 = vpack.c.bf16 %v720_v14, %v719_v11  ;;  %v721_v18 = vld [vmem:[%s6734_s24 + $0x30] sm:$0xff]  ;;  %v722_v19 = vld [vmem:[%s6734_s24 + $0x38] sm:$0xff]  ;;  %v5378_v21 = vpack.c.bf16 %v718_v16, %v717_v15  ;;  %v723_v33 = vld [vmem:[%s6734_s24 + $0x40] sm:$0xff]  ;;  %s6707_s26 = smov 120  }
  0x27   : > { %s677_s23 = scalar_lea.vmem %s6733_s29, %s4684_s2  ;;  %5376 = vmatpush3.bf16.msra.mxu0 %v5375_v13  ;;  %v5384_v22 = vpack.c.bf16 %v722_v19, %v721_v18  ;;  %v724_v35 = vld [vmem:[%s6734_s24 + $0x48] sm:$0xff]  ;;  %v727_v36 = vld [vmem:[%s6734_s24 + $0x60] sm:$0xff]  ;;  %v725_v42 = vld [vmem:[%s6734_s24 + $0x50] sm:$0xff]  ;;  %s6739_s2 = smov %s6738_s30 }
  0x28   : > { %v678_v1 = vld [vmem:[%s677_s23] sm:$0x3f]  ;;  %5382 = vmatpush3.bf16.msra.mxu1 %v5381_v17  ;;  %5377 = vmatprep.subr.bf16.mxu0 %v5699_v12  ;;  %v728_v37 = vld [vmem:[%s6734_s24 + $0x68] sm:$0xff]  ;;  %v5387_v40 = vpack.c.bf16 %v724_v35, %v723_v33  ;;  %v726_v44 = vld [vmem:[%s6734_s24 + $0x58] sm:$0xff]  ;;  %s672_s29 = sand.u32 1, %s5689_s28   ;;  %s6742_s23 = sld [smem:[#allocation19_spill]] }
  0x29   : > { %v5878_v2 = vadd.f32 %v679_v0, %v678_v1  ;;  %5383 = vmatprep.subr.bf16.mxu1 %v5699_v12  ;;  %v4685_v32 = vld [vmem:[%s6735_s1] ss:$0 sm:$0xff]  ;;  %v5393_v41 = vpack.c.bf16 %v728_v37, %v727_v36  ;;  %v729_v45 = vld [vmem:[%s6734_s24 + $0x70] sm:$0xff]  ;;  %v730_v46 = vld [vmem:[%s6734_s24 + $0x78] sm:$0xff]  ;;  %v5390_v47 = vpack.c.bf16 %v726_v44, %v725_v42  ;;  %s4613_s21 = scalar_lea.sflag [#allocation3], %s672_s29 }
  0x2a   : > { %v4686_v38 = vld [vmem:[%s6736_s25] ss:$0 sm:$0xff]  ;;  %v5396_v48 = vpack.c.bf16 %v730_v46, %v729_v45 }
  0x2b   : > { %v684_v3 = vsel %vm683_vm0, %v5878_v2, 0.0  ;;  %5379 = vmatpush3.bf16.msra.mxu0 %v5378_v21  ;;  %v4687_v55 = vld.sshfl [vmem:[%s6737_s5] sm:$0x33 pattern:$0x75316420] }
  0x2c   : > { %685 = vadd.xlane.f32.xlu0 %v684_v3  ;;  %5385 = vmatpush3.bf16.msra.mxu1 %v5384_v22  ;;  %v747_v56 = vrot.slane %v4687_v55, %v5964_v54  ;;  %v740_v58 = vcombine.high %v4687_v55, %v4687_v55 }
  0x2d   : > { %5386 = vmatprep.subr.bf16.mxu0 %v5699_v12  ;;  %5392 = vmatprep.subr.bf16.mxu1 %v5699_v12 }
  0x2e   : > { %v760_v59 = vrot.slane %v747_v56, %v5970_v57  ;;  %v754_v60 = vrot.slane %v740_v58, %v5964_v54 }
  0x30   : > { %v764_v0 = vrot.slane %v754_v60, %v5970_v57 }
  0xb9   : > { %v686_v4 = vpop.xlane.xlu0 %685 }
  0xba   : > { %v688_v5 = vmul.f32 0.03125, %v686_v4  ;;  %v756_v4 = vcombine.high %v754_v60, %v754_v60 }
  0xbc   : > { %v689_v6 = vsub.f32 %v5878_v2, %v688_v5  ;;  %v755_v5 = vcombine.high %v747_v56, %v747_v56 }
  0xbe   : > { %v690_v7 = vmul.f32 %v689_v6, %v689_v6 }
  0xc0   : > { %v691_v8 = vsel %vm683_vm0, %v690_v7, 0.0  ;;  %v772_v7 = vrot.slane %v756_v4, %v5970_v57 }
  0xc1   : > { %692 = vadd.xlane.f32.xlu0 %v691_v8  ;;  %v768_v8 = vrot.slane %v755_v5, %v5970_v57 }
 0x14e   : > { %v693_v23 = vpop.xlane.xlu0 %692 }
 0x14f   : > { %v694_v24 = vmul.f32 0.03125, %v693_v23 }
 0x151   : > { %v695_v25 = vadd.f32 1e-05, %v694_v24 }
 0x153   : > { %5579 = vrsqrt.f32 %v695_v25  ;;  %vm698_vm2 = vcmp.eq.f32.partialorder %v695_v25, inf  ;;  %v701_v28 = vand.u32 2147483648, %v695_v25  ;;  %vm700_vm3 = vcmp.eq.f32.partialorder %v695_v25, 0.0 }
 0x15d   : > { %v5580_v26 = vpop.eup %5579 }
 0x15e   : > { %v697_v27 = vmul.f32 %v5580_v26, %v695_v25 }
 0x160   : > { %v699_v29 = vsel %vm698_vm2, %v695_v25, %v697_v27  ;;  %vm4360_vm2 = vcmask 253952  }
 0x161   : > { %v702_v30 = vsel %vm700_vm3, %v701_v28, %v699_v29  ;;  %vm4610_vm3 = vcmask 57344  }
 0x162   : > { %5581 = vrcp.f32 %v702_v30 }
 0x16c   : > { %v5582_v31 = vpop.eup %5581 }
 0x16d   : > { %v704_v34 = vmul.f32 %v5582_v31, %v689_v6 }
 0x16f   : > { %v709_v39 = vmul.f32 %v4685_v32, %v704_v34 }
 0x171   : > { %v714_v43 = vadd.f32 %v4686_v38, %v709_v39 }
 0x173   : > { %4988 = vmatmul.mubr.msk.f32.vlgmr.msra.gmra.mrb[0].mxu0 %vm777_vm4, %v714_v43  ;;  %4999 = vmatmul.mubr.msk.f32.vlgmr.msra.gmra.mrb[0].mxu1 %vm777_vm4, %v714_v43 }
 0x174   : > { %5388 = vmatpush3.bf16.msra.mxu0 %v5387_v40  ;;  %5394 = vmatpush3.bf16.msra.mxu1 %v5393_v41 }
 0x175   : > { %5389 = vmatprep.subr.bf16.mxu0 %v5699_v12  ;;  %5395 = vmatprep.subr.bf16.mxu1 %v5699_v12 }
 0x176   : > { %5009 = vmatprep.mubr.msk.f32.mxu0 %vm5700_vm1, %v5701_v20  ;;  %5020 = vmatprep.mubr.msk.f32.mxu1 %vm5700_vm1, %v5701_v20 }
 0x178   : > { %5391 = vmatpush3.bf16.msra.mxu0 %v5390_v47  ;;  %5397 = vmatpush3.bf16.msra.mxu1 %v5396_v48 }
 0x179   : > { %5023 = vmatprep.subr.mxu0 %v5701_v20  ;;  %5028 = vmatprep.subr.mxu1 %v5701_v20 }
 0x17b   : > { %5010 = vmatmul.mubr.msk.f32.vlgmr.msra.gmra.mrb[2].mxu0 %vm777_vm4, %v714_v43  ;;  %5021 = vmatmul.mubr.msk.f32.vlgmr.msra.gmra.mrb[2].mxu1 %vm777_vm4, %v714_v43 }
 0x17c   : > { %5025 = vmatprep.mubr.msk.f32.mxu0 %vm5700_vm1, %v5701_v20  ;;  %5030 = vmatprep.mubr.msk.f32.mxu1 %vm5700_vm1, %v5701_v20 }
 0x246   : > { %v847_v61 = vpop.f32.mrb[0].mxu0  ;;  %v917_v62 = vpop.f32.mrb[0].mxu1 }
 0x247   : > { %v848_v63 = vadd.f32 %v847_v61, %v760_v59  ;;  %v4989_v1 = vpop.f32.mrb[1].mxu0  ;;  %v5000_v3 = vpop.f32.mrb[1].mxu1  ;;  %v918_v6 = vadd.f32 %v917_v62, %v764_v0 }
 0x249   : > { %1062 = vrot.lane.b32.xlu1 %v848_v63, %s6707_s26 }
 0x24d   : > { %1140 = vrot.lane.b32.xlu1 %v918_v6, %s6707_s26 }
 0x24e   : > { %v1057_v9 = vpop.f32.mrb[2].mxu1  ;;  %v987_v10 = vpop.f32.mrb[2].mxu0 }
 0x24f   : > { %v5979_v11 = vadd.f32 %v1057_v9, %v772_v7  ;;  %v5981_v13 = vadd.f32 %v987_v10, %v768_v8  ;;  %v5011_v14 = vpop.f32.mrb[3].mxu0  ;;  %v5022_v15 = vpop.f32.mrb[3].mxu1  ;;  %v1725_v8 = vld [vmem:[%s6738_s30] sm:$0xff]  ;;  %v1726_v9 = vld [vmem:[%s6739_s2 + $0x8] sm:$0xff]  ;;  %v1727_v10 = vld [vmem:[%s6739_s2 + $0x10] sm:$0xff]  ;;  %s4801_s30 = sshll.u32 %s5843_s4, 4 }
 0x250   : > { %v1728_v14 = vld [vmem:[%s6739_s2 + $0x18] sm:$0xff]  ;;  %s5706_s4 = smov [#allocation2]  }
 0x251   : > { %1217 = vrot.lane.b32.xlu0 %v5981_v13, %s6707_s26  ;;  %1294 = vrot.lane.b32.xlu1 %v5979_v11, %s6707_s26  ;;  %s6740_s26 = smov 120  }
 0x2bb   : > { %v1063_v16 = vpop.permute.xlu1 %1062 }
 0x2bc   : > { %5024 = vmatpush3.xpose.msk.msra.mxu0 %vm1064_vm5, %v1063_v16 }
 0x2bd   : > { %5033 = vmatprep.subr.mxu0 %v5701_v20 }
 0x2bf   : > { %5026 = vmatmul.mubr.msk.f32.vlgmr.msra.gmra.mrb[4].mxu0 %vm1064_vm5, %v848_v63  ;;  %v1141_v17 = vpop.permute.xlu1 %1140 }
 0x2c0   : > { %5029 = vmatpush3.xpose.msk.msra.mxu1 %vm1064_vm5, %v1141_v17  ;;  %5035 = vmatprep.mubr.msk.f32.mxu0 %vm5700_vm1, %v5701_v20 }
 0x2c1   : > { %5038 = vmatprep.subr.mxu1 %v5701_v20 }
 0x2c3   : > { %v1218_v18 = vpop.permute.xlu0 %1217  ;;  %5031 = vmatmul.mubr.msk.f32.vlgmr.msra.gmra.mrb[4].mxu1 %vm1064_vm5, %v918_v6  ;;  %v1295_v19 = vpop.permute.xlu1 %1294 }
 0x2c4   : > { %5034 = vmatpush3.xpose.msk.msra.mxu0 %vm1064_vm5, %v1218_v18  ;;  %5039 = vmatpush3.xpose.msk.msra.mxu1 %vm1064_vm5, %v1295_v19 }
 0x2c5   : > { %5040 = vmatprep.mubr.msk.f32.mxu1 %vm5700_vm1, %v5701_v20  ;;  %5043 = vmatprep.subr.mxu0 %v5701_v20 }
 0x2c6   : > { %5048 = vmatprep.subr.mxu1 %v5701_v20 }
 0x2c7   : > { %5036 = vmatmul.mubr.msk.f32.vlgmr.msra.gmra.mrb[6].mxu0 %vm1064_vm5, %v5981_v13  ;;  %5041 = vmatmul.mubr.msk.f32.vlgmr.msra.gmra.mrb[6].mxu1 %vm1064_vm5, %v5979_v11 }
 0x2c8   : > { %5045 = vmatprep.mubr.msk.f32.mxu0 %vm5700_vm1, %v5701_v20  ;;  %5050 = vmatprep.mubr.msk.f32.mxu1 %vm5700_vm1, %v5701_v20 }
 0x392   : > { %v1135_v21 = vpop.f32.mrb[4].mxu0 }
 0x393   : > { %v5027_v22 = vpop.f32.mrb[5].mxu0  ;;  %v1371_v23 = vsel %vm1370_vm6, %v1135_v21, -inf }
 0x394   : > { %1372 = vmax.xlane.f32.xlu1 %v1371_v23 }
 0x396   : > { %v1212_v24 = vpop.f32.mrb[4].mxu1 }
 0x397   : > { %v5032_v25 = vpop.f32.mrb[5].mxu1  ;;  %v1374_v26 = vsel %vm1370_vm6, %v1212_v24, -inf }
 0x398   : > { %1375 = vmax.xlane.f32.xlu0 %v1374_v26 }
 0x39a   : > { %v1289_v27 = vpop.f32.mrb[6].mxu0  ;;  %v1366_v28 = vpop.f32.mrb[6].mxu1 }
 0x39b   : > { %v5037_v29 = vpop.f32.mrb[7].mxu0  ;;  %v5042_v30 = vpop.f32.mrb[7].mxu1  ;;  %v1377_v31 = vsel %vm1370_vm6, %v1289_v27, -inf  ;;  %v1380_v32 = vsel %vm1370_vm6, %v1366_v28, -inf }
 0x39c   : > { %1378 = vmax.xlane.f32.xlu1 %v1377_v31 }
 0x3a0   : > { %1381 = vmax.xlane.f32.xlu1 %v1380_v32 }
 0x3ae   : > { %1415 = vrot.lane.b32.xlu0 %v848_v63, %s6705_s27 }
 0x3b1   : > { %1494 = vrot.lane.b32.xlu1 %v918_v6, %s6705_s27 }
 0x421   : > { %v1373_v33 = vpop.xlane.xlu1 %1372 }
 0x422   : > { %v1383_v34 = vsub.f32 %v1135_v21, %v1373_v33 }
 0x424   : > { %v1387_v35 = vmul.f32 1.442695, %v1383_v34 }
 0x425   : > { %v1376_v36 = vpop.xlane.xlu0 %1375 }
 0x426   : > { %5583 = vpow2.f32 %v1387_v35  ;;  %v1384_v37 = vsub.f32 %v1212_v24, %v1376_v36  ;;  %v4712_v35 = vld [vmem:[%s6677_s7] ss:$0 sm:$0xff] }
 0x428   : > { %v1389_v38 = vmul.f32 1.442695, %v1384_v37 }
 0x429   : > { %v1379_v39 = vpop.xlane.xlu1 %1378  ;;  %v1416_v40 = vpop.permute.xlu0 %1415 }
 0x42a   : > { %5585 = vpow2.f32 %v1389_v38  ;;  %v1385_v41 = vsub.f32 %v1289_v27, %v1379_v39  ;;  %5044 = vmatpush3.msk.msra.mxu0 %vm1421_vm7, %v1416_v40 }
 0x42b   : > { %5053 = vmatprep.subr.mxu0 %v5701_v20 }
 0x42c   : > { %v1391_v42 = vmul.f32 1.442695, %v1385_v41 }
 0x42d   : > { %v1382_v43 = vpop.xlane.xlu1 %1381 }
 0x42e   : > { %5587 = vpow2.f32 %v1391_v42  ;;  %v1386_v44 = vsub.f32 %v1366_v28, %v1382_v43 }
 0x430   : > { %v5584_v45 = vpop.eup %5583  ;;  %v1393_v46 = vmul.f32 1.442695, %v1386_v44 }
 0x431   : > { %v1495_v47 = vpop.permute.xlu1 %1494  ;;  %v1395_v48 = vsel %vm1370_vm6, %v5584_v45, 0.0 }
 0x432   : > { %5589 = vpow2.f32 %v1393_v46  ;;  %5049 = vmatpush3.msk.msra.mxu1 %vm1421_vm7, %v1495_v47  ;;  %1396 = vadd.xlane.f32.xlu1 %v1395_v48  ;;  %v2067_v46 = vld [vmem:[%s6680_s10] sm:$0xff]  ;;  %v2069_v47 = vld [vmem:[%s6680_s10 + $0x10] sm:$0xff] }
 0x433   : > { %5058 = vmatprep.subr.mxu1 %v5701_v20 }
 0x434   : > { %v5586_v49 = vpop.eup %5585 }
 0x435   : > { %v1398_v50 = vsel %vm1370_vm6, %v5586_v49, 0.0 }
 0x436   : > { %1399 = vadd.xlane.f32.xlu1 %v1398_v50 }
 0x438   : > { %v5588_v51 = vpop.eup %5587 }
 0x439   : > { %v1401_v52 = vsel %vm1370_vm6, %v5588_v51, 0.0 }
 0x43a   : > { %1402 = vadd.xlane.f32.xlu0 %v1401_v52 }
 0x43c   : > { %v5590_v53 = vpop.eup %5589 }
 0x43d   : > { %v1404_v55 = vsel %vm1370_vm6, %v5590_v53, 0.0 }
 0x43e   : > { %1405 = vadd.xlane.f32.xlu1 %v1404_v55 }
 0x44f   : > { %1571 = vrot.lane.b32.xlu1 %v5981_v13, %s6705_s27 }
 0x450   : > { %1648 = vrot.lane.b32.xlu0 %v5979_v11, %s6705_s27 }
 0x4bf   : > { %v1397_v56 = vpop.xlane.xlu1 %1396 }
 0x4c0   : > { %5591 = vrcp.f32 %v1397_v56 }
 0x4c3   : > { %v1400_v58 = vpop.xlane.xlu1 %1399 }
 0x4c4   : > { %5593 = vrcp.f32 %v1400_v58 }
 0x4c7   : > { %v1403_v59 = vpop.xlane.xlu0 %1402 }
 0x4c8   : > { %5595 = vrcp.f32 %v1403_v59 }
 0x4ca   : > { %v5592_v60 = vpop.eup %5591 }
 0x4cb   : > { %v1408_v61 = vmul.f32 %v5592_v60, %v5584_v45  ;;  %v1406_v62 = vpop.xlane.xlu1 %1405  ;;  %v1649_v3 = vpop.permute.xlu0 %1648 }
 0x4cc   : > { %5597 = vrcp.f32 %v1406_v62  ;;  %v4713_v62 = vld [vmem:[%s6678_s8] ss:$0 sm:$0xff] }
 0x4cd   : > { %5046 = vmatmul.mubr.msk.f32.vlgmr.msra.gmra.mrb[8].mxu0 %vm1417_vm8, %v1408_v61 }
 0x4ce   : > { %v5594_v63 = vpop.eup %5593  ;;  %5055 = vmatprep.mubr.msk.f32.mxu0 %vm5700_vm1, %v5701_v20 }
 0x4cf   : > { %v1410_v0 = vmul.f32 %v5594_v63, %v5586_v49  ;;  %v1572_v1 = vpop.permute.xlu1 %1571  ;;  %v2070_v49 = vld [vmem:[%s6680_s10 + $0x18] sm:$0xff] }
 0x4d0   : > { %5054 = vmatpush3.msk.msra.mxu0 %vm1421_vm7, %v1572_v1  ;;  %v5402_v50 = vpack.c.bf16 %v2070_v49, %v2069_v47 }
 0x4d1   : > { %5051 = vmatmul.mubr.msk.f32.vlgmr.msra.gmra.mrb[8].mxu1 %vm1417_vm8, %v1410_v0  ;;  %5063 = vmatprep.subr.mxu0 %v5701_v20  ;;  %v4714_v0 = vld [vmem:[%s6679_s9] ss:$0 sm:$0xff] }
 0x4d2   : > { %v5596_v4 = vpop.eup %5595  ;;  %5059 = vmatpush3.msk.msra.mxu1 %vm1421_vm7, %v1649_v3  ;;  %5060 = vmatprep.mubr.msk.f32.mxu1 %vm5700_vm1, %v5701_v20 }
 0x4d3   : > { %v1412_v5 = vmul.f32 %v5596_v4, %v5588_v51  ;;  %5068 = vmatprep.subr.mxu1 %v5701_v20  ;;  %v2176_v4 = vld [vmem:[%s6682_s12] sm:$0xff] }
 0x4d5   : > { %5056 = vmatmul.mubr.msk.f32.vlgmr.msra.gmra.mrb[10].mxu0 %vm1417_vm8, %v1412_v5  ;;  %v2177_v5 = vld [vmem:[%s6682_s12 + $0x8] sm:$0xff] }
 0x4d6   : > { %v5598_v6 = vpop.eup %5597  ;;  %5065 = vmatprep.mubr.msk.f32.mxu0 %vm5700_vm1, %v5701_v20  ;;  %5064 = vmatpush3.msra.mxu0 %v1725_v8  ;;  %v2179_v8 = vld [vmem:[%s6682_s12 + $0x18] sm:$0xff] }
 0x4d7   : > { %v1414_v7 = vmul.f32 %v5598_v6, %v5590_v53  ;;  %5073 = vmatprep.subr.mxu0 %v5701_v20  ;;  %v5405_v6 = vpack.c.bf16 %v2177_v5, %v2176_v4 }
 0x4d9   : > { %5061 = vmatmul.mubr.msk.f32.vlgmr.msra.gmra.mrb[10].mxu1 %vm1417_vm8, %v1414_v7  ;;  %v2178_v7 = vld [vmem:[%s6682_s12 + $0x10] sm:$0xff] }
 0x4da   : > { %5070 = vmatprep.mubr.msk.f32.mxu1 %vm5700_vm1, %v5701_v20  ;;  %5069 = vmatpush3.msra.mxu1 %v1726_v9  ;;  %v5408_v9 = vpack.c.bf16 %v2179_v8, %v2178_v7 }
 0x4db   : > { %5078 = vmatprep.subr.mxu1 %v5701_v20 }
 0x5a0   : > { %v1490_v11 = vpop.f32.mrb[8].mxu0 }
 0x5a1   : > { %v5047_v13 = vpop.f32.mrb[9].mxu0  ;;  %5066 = vmatmul.mubr.msk.f32.vlgmr.msra.gmra.mrb[12].mxu0 %vm1064_vm5, %v1490_v11  ;;  %v2181_v11 = vld [vmem:[%s6682_s12 + $0x28] sm:$0xff] }
 0x5a2   : > { %5074 = vmatpush3.msra.mxu0 %v1727_v10  ;;  %5075 = vmatprep.mubr.msk.f32.mxu0 %vm5700_vm1, %v5701_v20  ;;  %v2180_v10 = vld [vmem:[%s6682_s12 + $0x20] sm:$0xff] }
 0x5a3   : > { %5398 = vmatprep.subr.bf16.mxu0 %v5699_v12  ;;  %v5411_v13 = vpack.c.bf16 %v2181_v11, %v2180_v10  ;;  %v4720_v10 = vld [vmem:[%s6734_s24 + $0x80] sm:$0xff]  ;;  %v4722_v11 = vld [vmem:[%s6734_s24 + $0x90] sm:$0xff] }
 0x5a4   : > { %v1567_v15 = vpop.f32.mrb[8].mxu1 }
 0x5a5   : > { %v5052_v16 = vpop.f32.mrb[9].mxu1  ;;  %5071 = vmatmul.mubr.msk.f32.vlgmr.msra.gmra.mrb[12].mxu1 %vm1064_vm5, %v1567_v15  ;;  %v2183_v15 = vld [vmem:[%s6682_s12 + $0x38] sm:$0xff] }
 0x5a6   : > { %5079 = vmatpush3.msra.mxu1 %v1728_v14  ;;  %5080 = vmatprep.mubr.msk.f32.mxu1 %vm5700_vm1, %v5701_v20  ;;  %v2182_v14 = vld [vmem:[%s6682_s12 + $0x30] sm:$0xff] }
 0x5a7   : > { %5404 = vmatprep.subr.bf16.mxu1 %v5699_v12  ;;  %v5414_v16 = vpack.c.bf16 %v2183_v15, %v2182_v14  ;;  %v4723_v14 = vld [vmem:[%s6734_s24 + $0x98] sm:$0xff] }
 0x5a8   : > { %v1644_v17 = vpop.f32.mrb[10].mxu0  ;;  %v5432_v15 = vpack.c.bf16 %v4723_v14, %v4722_v11 }
 0x5a9   : > { %v5057_v18 = vpop.f32.mrb[11].mxu0  ;;  %5076 = vmatmul.mubr.msk.f32.vlgmr.msra.gmra.mrb[14].mxu0 %vm1064_vm5, %v1644_v17  ;;  %v2184_v17 = vld [vmem:[%s6682_s12 + $0x40] sm:$0xff] }
 0x5aa   : > { %5091 = vmatprep.mubr.msk.f32.mxu0 %vm5700_vm1, %v5701_v20  ;;  %v2185_v18 = vld [vmem:[%s6682_s12 + $0x48] sm:$0xff] }
 0x5ac   : > { %v1721_v19 = vpop.f32.mrb[10].mxu1 }
 0x5ad   : > { %v5062_v21 = vpop.f32.mrb[11].mxu1  ;;  %5081 = vmatmul.mubr.msk.f32.vlgmr.msra.gmra.mrb[14].mxu1 %vm1064_vm5, %v1721_v19  ;;  %v5417_v19 = vpack.c.bf16 %v2185_v18, %v2184_v17 }
 0x5ae   : > { %5126 = vmatprep.mubr.msk.f32.mxu1 %vm5700_vm1, %v5701_v20  ;;  %5406 = vmatpush3.bf16.msra.mxu1 %v5405_v6  ;;  %v2186_v21 = vld [vmem:[%s6682_s12 + $0x50] sm:$0xff] }
 0x5af   : > { %5407 = vmatprep.subr.bf16.mxu1 %v5699_v12 }
 0x5b2   : > { %5409 = vmatpush3.bf16.msra.mxu1 %v5408_v9 }
 0x5b3   : > { %5410 = vmatprep.subr.bf16.mxu1 %v5699_v12 }
 0x5b6   : > { %5412 = vmatpush3.bf16.msra.mxu1 %v5411_v13 }
 0x5b7   : > { %5413 = vmatprep.subr.bf16.mxu1 %v5699_v12 }
 0x5ba   : > { %5415 = vmatpush3.bf16.msra.mxu1 %v5414_v16 }
 0x5bb   : > { %5416 = vmatprep.subr.bf16.mxu1 %v5699_v12 }
 0x5be   : > { %5418 = vmatpush3.bf16.msra.mxu1 %v5417_v19 }
 0x5bf   : > { %5419 = vmatprep.subr.bf16.mxu1 %v5699_v12 }
 0x674   : > { %v1798_v22 = vpop.f32.mrb[12].mxu0 }
 0x675   : > { %v5067_v23 = vpop.f32.mrb[13].mxu0  ;;  %v2021_v25 = vsel %vm683_vm0, %v1798_v22, 0.0  ;;  %v2187_v22 = vld [vmem:[%s6682_s12 + $0x58] sm:$0xff] }
 0x676   : > { %v5420_v23 = vpack.c.bf16 %v2187_v22, %v2186_v21 }
 0x678   : > { %v1871_v24 = vpop.f32.mrb[12].mxu1  ;;  %5421 = vmatpush3.bf16.msra.mxu1 %v5420_v23 }
 0x679   : > { %v2022_v26 = vsel %vm683_vm0, %v1871_v24, 0.0  ;;  %v5072_v27 = vpop.f32.mrb[13].mxu1  ;;  %5422 = vmatprep.subr.bf16.mxu1 %v5699_v12  ;;  %v2188_v24 = vld [vmem:[%s6682_s12 + $0x60] sm:$0xff] }
 0x67a   : > { %v2023_v28 = vadd.f32 %v2022_v26, %v2021_v25  ;;  %v2189_v25 = vld [vmem:[%s6682_s12 + $0x68] sm:$0xff]  ;;  %v2190_v27 = vld [vmem:[%s6682_s12 + $0x70] sm:$0xff] }
 0x67b   : > { %v5423_v26 = vpack.c.bf16 %v2189_v25, %v2188_v24 }
 0x67c   : > { %v1944_v29 = vpop.f32.mrb[14].mxu0 }
 0x67d   : > { %v2024_v30 = vsel %vm683_vm0, %v1944_v29, 0.0  ;;  %v5077_v31 = vpop.f32.mrb[15].mxu0  ;;  %5424 = vmatpush3.bf16.msra.mxu1 %v5423_v26  ;;  %v4718_v26 = vld [vmem:[%s6735_s1 + $0x1] ss:$0 sm:$0xff]  ;;  %s6744_s1 = sld [smem:[#allocation20_spill]] }
 0x67e   : > { %v2025_v32 = vadd.f32 %v2024_v30, %v2023_v28  ;;  %5425 = vmatprep.subr.bf16.mxu1 %v5699_v12  ;;  %v2191_v28 = vld [vmem:[%s6682_s12 + $0x78] sm:$0xff]  ;;  %v4715_v30 = vld [vmem:[%s6681_s11] ss:$0 sm:$0xff] }
 0x67f   : > { %v5426_v29 = vpack.c.bf16 %v2191_v28, %v2190_v27  ;;  %v4724_v28 = vld [vmem:[%s6734_s24 + $0xa0] sm:$0xff] }
 0x680   : > { %v2017_v33 = vpop.f32.mrb[14].mxu1 }
 0x681   : > { %v2026_v34 = vsel %vm683_vm0, %v2017_v33, 0.0  ;;  %v5082_v36 = vpop.f32.mrb[15].mxu1  ;;  %5427 = vmatpush3.bf16.msra.mxu1 %v5426_v29  ;;  %v4725_v29 = vld [vmem:[%s6734_s24 + $0xa8] sm:$0xff] }
 0x682   : > { %v2027_v37 = vadd.f32 %v2026_v34, %v2025_v32  ;;  %5173 = vmatprep.subr.mxu1 %v5701_v20 }
 0x684   : > { %v2033_v38 = vadd.f32 %v4712_v35, %v2027_v37 }
 0x686   : > { %v6079_v39 = vadd.f32 %v2033_v38, %v5878_v2  ;;  %v2068_v2 = vld [vmem:[%s6680_s10 + $0x8] sm:$0xff] }
 0x687   : > { %v5399_v48 = vpack.c.bf16 %v2068_v2, %v2067_v46 }
 0x688   : > { %v2037_v40 = vsel %vm683_vm0, %v6079_v39, 0.0 }
 0x689   : > { %2038 = vadd.xlane.f32.xlu1 %v2037_v40  ;;  %5400 = vmatpush3.bf16.msra.mxu0 %v5399_v48 }
 0x68a   : > { %5401 = vmatprep.subr.bf16.mxu0 %v5699_v12 }
 0x68d   : > { %5403 = vmatpush3.bf16.msra.mxu0 %v5402_v50 }
 0x68e   : > { %5428 = vmatprep.subr.bf16.mxu0 %v5699_v12 }
 0x716   : > { %v2039_v41 = vpop.xlane.xlu1 %2038 }
 0x717   : > { %v2040_v42 = vmul.f32 0.03125, %v2039_v41 }
 0x719   : > { %v2041_v43 = vsub.f32 %v6079_v39, %v2040_v42 }
 0x71b   : > { %v2042_v44 = vmul.f32 %v2041_v43, %v2041_v43 }
 0x71d   : > { %v2043_v45 = vsel %vm683_vm0, %v2042_v44, 0.0 }
 0x71e   : > { %2044 = vadd.xlane.f32.xlu0 %v2043_v45 }
 0x7ab   : > { %v2045_v51 = vpop.xlane.xlu0 %2044 }
 0x7ac   : > { %v2046_v52 = vmul.f32 0.03125, %v2045_v51 }
 0x7ae   : > { %v2047_v53 = vadd.f32 1e-05, %v2046_v52 }
 0x7b0   : > { %5599 = vrsqrt.f32 %v2047_v53  ;;  %vm2050_vm9 = vcmp.eq.f32.partialorder %v2047_v53, inf  ;;  %v2053_v58 = vand.u32 2147483648, %v2047_v53  ;;  %vm2052_vm10 = vcmp.eq.f32.partialorder %v2047_v53, 0.0 }
 0x7ba   : > { %v5600_v55 = vpop.eup %5599 }
 0x7bb   : > { %v2049_v56 = vmul.f32 %v5600_v55, %v2047_v53  ;;  %v5705_v55 = vmov -1.0  }
 0x7bd   : > { %v2051_v59 = vsel %vm2050_vm9, %v2047_v53, %v2049_v56 }
 0x7be   : > { %v2054_v60 = vsel %vm2052_vm10, %v2053_v58, %v2051_v59 }
 0x7bf   : > { %5601 = vrcp.f32 %v2054_v60 }
 0x7c9   : > { %v5602_v61 = vpop.eup %5601 }
 0x7ca   : > { %v2056_v63 = vmul.f32 %v5602_v61, %v2041_v43 }
 0x7cc   : > { %v2061_v1 = vmul.f32 %v4713_v62, %v2056_v63  ;;  %v4717_v63 = vld [vmem:[%s6683_s13] ss:$0 sm:$0xff] }
 0x7ce   : > { %v2066_v3 = vadd.f32 %v4714_v0, %v2061_v1 }
 0x7d0   : > { %5092 = vmatmul.mubr.msk.f32.vlgmr.msra.gmra.mrb[16].mxu0 %vm777_vm4, %v2066_v3 }
 0x7d1   : > { %5137 = vmatprep.mubr.msk.f32.mxu0 %vm5700_vm1, %v5701_v20 }
 0x8a3   : > { %v2145_v31 = vpop.f32.mrb[16].mxu0 }
 0x8a4   : > { %v2146_v32 = vadd.f32 %v4715_v30, %v2145_v31  ;;  %v5093_v33 = vpop.f32.mrb[17].mxu0  ;;  %v4719_v30 = vld [vmem:[%s6736_s25 + $0x1] ss:$0 sm:$0xff] }
 0x8a6   : > { %v2150_v34 = vmul.f32 0.70710677, %v2146_v32  ;;  %v2149_v59 = vmul.f32 0.5, %v2146_v32  ;;  %v5435_v32 = vpack.c.bf16 %v4725_v29, %v4724_v28 }
 0x8a8   : > { %v2153_v35 = vand.u32 2147483647, %v2150_v34  ;;  %vm2151_vm11 = vcmp.ge.f32.partialorder %v2150_v34, 0.0  ;;  %v4726_v34 = vld [vmem:[%s6734_s24 + $0xb0] sm:$0xff] }
 0x8a9   : > { %v2152_v56 = vsel %vm2151_vm11, 1.0, %v5705_v55 }
 0x8aa   : > { %v2154_v36 = vmul.f32 0.3275911, %v2153_v35  ;;  %v2167_v38 = vsub.f32 0.0, %v2153_v35 }
 0x8ac   : > { %v2155_v37 = vadd.f32 1.0, %v2154_v36  ;;  %v2168_v41 = vmul.f32 %v2167_v38, %v2153_v35  ;;  %v4727_v35 = vld [vmem:[%s6734_s24 + $0xb8] sm:$0xff]  ;;  %v4729_v38 = vld [vmem:[%s6734_s24 + $0xc8] sm:$0xff] }
 0x8ad   : > { %v5438_v36 = vpack.c.bf16 %v4727_v35, %v4726_v34 }
 0x8ae   : > { %5603 = vrcp.f32 %v2155_v37  ;;  %v2169_v44 = vmul.f32 1.442695, %v2168_v41  ;;  %v4728_v37 = vld [vmem:[%s6734_s24 + $0xc0] sm:$0xff]  ;;  %v4730_v41 = vld [vmem:[%s6734_s24 + $0xd0] sm:$0xff] }
 0x8b0   : > { %5605 = vpow2.f32 %v2169_v44  ;;  %v4732_v44 = vld [vmem:[%s6734_s24 + $0xe0] sm:$0xff] }
 0x8b8   : > { %v5604_v40 = vpop.eup %5603 }
 0x8b9   : > { %v2158_v42 = vmul.f32 1.0614054, %v5604_v40 }
 0x8ba   : > { %v5606_v51 = vpop.eup %5605 }
 0x8bb   : > { %v2159_v43 = vadd.f32 -1.4531521, %v2158_v42  ;;  %v4731_v42 = vld [vmem:[%s6734_s24 + $0xd8] sm:$0xff] }
 0x8bd   : > { %v2160_v45 = vmul.f32 %v5604_v40, %v2159_v43  ;;  %v5444_v43 = vpack.c.bf16 %v4731_v42, %v4730_v41 }
 0x8bf   : > { %v2161_v46 = vadd.f32 1.4214138, %v2160_v45  ;;  %v4733_v45 = vld [vmem:[%s6734_s24 + $0xe8] sm:$0xff] }
 0x8c1   : > { %v2162_v2 = vmul.f32 %v5604_v40, %v2161_v46  ;;  %v5447_v46 = vpack.c.bf16 %v4733_v45, %v4732_v44 }
 0x8c3   : > { %v2163_v47 = vadd.f32 -0.28449672, %v2162_v2  ;;  %v4734_v2 = vld [vmem:[%s6734_s24 + $0xf0] sm:$0xff] }
 0x8c5   : > { %v2164_v48 = vmul.f32 %v5604_v40, %v2163_v47  ;;  %v4735_v47 = vld [vmem:[%s6734_s24 + $0xf8] sm:$0xff] }
 0x8c7   : > { %v2165_v49 = vadd.f32 0.2548296, %v2164_v48  ;;  %v5450_v48 = vpack.c.bf16 %v4735_v47, %v4734_v2 }
 0x8c9   : > { %v2166_v50 = vmul.f32 %v5604_v40, %v2165_v49  ;;  %v5441_v40 = vpack.c.bf16 %v4729_v38, %v4728_v37  ;;  %v4737_v49 = vld.sshfl [vmem:[%s6737_s5 + $0x4] sm:$0x33 pattern:$0x75316420] }
 0x8cb   : > { %v2171_v52 = vmul.f32 %v5606_v51, %v2166_v50  ;;  %v2335_v50 = vrot.slane %v4737_v49, %v5964_v54 }
 0x8cd   : > { %v2172_v53 = vsub.f32 1.0, %v2171_v52  ;;  %v2348_v51 = vrot.slane %v2335_v50, %v5970_v57  ;;  %v2328_v52 = vcombine.high %v4737_v49, %v4737_v49 }
 0x8cf   : > { %v2173_v58 = vmul.f32 %v2172_v53, %v2152_v56 }
 0x8d1   : > { %v2174_v60 = vadd.f32 1.0, %v2173_v58 }
 0x8d3   : > { %v2175_v61 = vmul.f32 %v2174_v60, %v2149_v59  ;;  %v2342_v59 = vrot.slane %v2328_v52, %v5964_v54 }
 0x8d5   : > { %5127 = vmatmul.mubr.f32.vlgmr.msra.gmra.mrb[16].mxu1 %v2175_v61  ;;  %v2352_v60 = vrot.slane %v2342_v59, %v5970_v57 }
 0x8d6   : > { %5175 = vmatprep.mubr.msk.f32.mxu1 %vm5700_vm1, %v5701_v20 }
 0x9a8   : > { %v2258_v62 = vpop.f32.mrb[16].mxu1 }
 0x9a9   : > { %v2262_v0 = vadd.f32 %v2258_v62, %v6079_v39  ;;  %v5128_v1 = vpop.f32.mrb[17].mxu1  ;;  %v4721_v39 = vld [vmem:[%s6734_s24 + $0x88] sm:$0xff] }
 0x9aa   : > { %v5429_v13 = vpack.c.bf16 %v4721_v39, %v4720_v10 }
 0x9ab   : > { %v6174_v3 = vadd.f32 %v4717_v63, %v2262_v0  ;;  %v2343_v0 = vcombine.high %v2335_v50, %v2335_v50 }
 0x9ac   : > { %5430 = vmatpush3.bf16.msra.mxu0 %v5429_v13 }
 0x9ad   : > { %v2271_v4 = vsel %vm683_vm0, %v6174_v3, 0.0  ;;  %5431 = vmatprep.subr.bf16.mxu0 %v5699_v12  ;;  %v2356_v1 = vrot.slane %v2343_v0, %v5970_v57 }
 0x9ae   : > { %2272 = vadd.xlane.f32.xlu0 %v2271_v4 }
 0x9b0   : > { %5433 = vmatpush3.bf16.msra.mxu0 %v5432_v15 }
 0x9b1   : > { %5434 = vmatprep.subr.bf16.mxu0 %v5699_v12 }
 0xa3b   : > { %v2273_v5 = vpop.xlane.xlu0 %2272 }
 0xa3c   : > { %v2274_v6 = vmul.f32 0.03125, %v2273_v5 }
 0xa3e   : > { %v2275_v7 = vsub.f32 %v6174_v3, %v2274_v6 }
 0xa40   : > { %v2276_v8 = vmul.f32 %v2275_v7, %v2275_v7 }
 0xa42   : > { %v2277_v9 = vsel %vm683_vm0, %v2276_v8, 0.0 }
 0xa43   : > { %2278 = vadd.xlane.f32.xlu1 %v2277_v9 }
 0xad0   : > { %v2279_v16 = vpop.xlane.xlu1 %2278 }
 0xad1   : > { %v2280_v17 = vmul.f32 0.03125, %v2279_v16 }
 0xad3   : > { %v2281_v18 = vadd.f32 1e-05, %v2280_v17 }
 0xad5   : > { %5607 = vrsqrt.f32 %v2281_v18  ;;  %vm2284_vm12 = vcmp.eq.f32.partialorder %v2281_v18, inf  ;;  %v2287_v22 = vand.u32 2147483648, %v2281_v18  ;;  %vm2286_vm13 = vcmp.eq.f32.partialorder %v2281_v18, 0.0 }
 0xadf   : > { %v5608_v19 = vpop.eup %5607 }
 0xae0   : > { %v2283_v21 = vmul.f32 %v5608_v19, %v2281_v18 }
 0xae2   : > { %v2285_v23 = vsel %vm2284_vm12, %v2281_v18, %v2283_v21 }
 0xae3   : > { %v2288_v24 = vsel %vm2286_vm13, %v2287_v22, %v2285_v23 }
 0xae4   : > { %5609 = vrcp.f32 %v2288_v24 }
 0xaee   : > { %v5610_v25 = vpop.eup %5609 }
 0xaef   : > { %v2290_v27 = vmul.f32 %v5610_v25, %v2275_v7  ;;  %v2344_v7 = vcombine.high %v2342_v59, %v2342_v59 }
 0xaf1   : > { %v2295_v31 = vmul.f32 %v4718_v26, %v2290_v27  ;;  %v2360_v8 = vrot.slane %v2344_v7, %v5970_v57  ;;  %v4760_v7 = vld [vmem:[%s6739_s2 + $0x30] sm:$0xff] }
 0xaf3   : > { %v2300_v33 = vadd.f32 %v4719_v30, %v2295_v31 }
 0xaf5   : > { %5138 = vmatmul.mubr.msk.f32.vlgmr.msra.gmra.mrb[18].mxu0 %vm777_vm4, %v2300_v33 }
 0xaf6   : > { %5436 = vmatpush3.bf16.msra.mxu0 %v5435_v32  ;;  %5148 = vmatprep.mubr.msk.f32.mxu0 %vm5700_vm1, %v5701_v20 }
 0xaf7   : > { %5437 = vmatprep.subr.bf16.mxu0 %v5699_v12 }
 0xafa   : > { %5439 = vmatpush3.bf16.msra.mxu0 %v5438_v36 }
 0xafb   : > { %5440 = vmatprep.subr.bf16.mxu0 %v5699_v12 }
 0xafd   : > { %5149 = vmatmul.mubr.msk.f32.vlgmr.msra.gmra.mrb[20].mxu0 %vm777_vm4, %v2300_v33 }
 0xafe   : > { %5442 = vmatpush3.bf16.msra.mxu0 %v5441_v40  ;;  %5159 = vmatprep.mubr.msk.f32.mxu0 %vm5700_vm1, %v5701_v20 }
 0xaff   : > { %5443 = vmatprep.subr.bf16.mxu0 %v5699_v12 }
 0xb02   : > { %5445 = vmatpush3.bf16.msra.mxu0 %v5444_v43 }
 0xb03   : > { %5446 = vmatprep.subr.bf16.mxu0 %v5699_v12 }
 0xb05   : > { %5160 = vmatmul.mubr.msk.f32.vlgmr.msra.gmra.mrb[22].mxu0 %vm777_vm4, %v2300_v33 }
 0xb06   : > { %5448 = vmatpush3.bf16.msra.mxu0 %v5447_v46  ;;  %5170 = vmatprep.mubr.msk.f32.mxu0 %vm5700_vm1, %v5701_v20 }
 0xb07   : > { %5449 = vmatprep.subr.bf16.mxu0 %v5699_v12 }
 0xb0a   : > { %5451 = vmatpush3.bf16.msra.mxu0 %v5450_v48 }
 0xb0b   : > { %5183 = vmatprep.subr.mxu0 %v5701_v20 }
 0xb0d   : > { %5171 = vmatmul.mubr.msk.f32.vlgmr.msra.gmra.mrb[24].mxu0 %vm777_vm4, %v2300_v33 }
 0xb0e   : > { %5185 = vmatprep.mubr.msk.f32.mxu0 %vm5700_vm1, %v5701_v20 }
 0xbc8   : > { %v2434_v53 = vpop.f32.mrb[18].mxu0 }
 0xbc9   : > { %v2435_v56 = vadd.f32 %v2434_v53, %v2348_v51  ;;  %v5139_v58 = vpop.f32.mrb[19].mxu0 }
 0xbcb   : > { %2649 = vrot.lane.b32.xlu0 %v2435_v56, %s6740_s26 }
 0xbd0   : > { %v2504_v61 = vpop.f32.mrb[20].mxu0 }
 0xbd1   : > { %v2505_v62 = vadd.f32 %v2504_v61, %v2352_v60  ;;  %v5150_v63 = vpop.f32.mrb[21].mxu0 }
 0xbd3   : > { %2726 = vrot.lane.b32.xlu1 %v2505_v62, %s6740_s26 }
 0xbd8   : > { %v2574_v4 = vpop.f32.mrb[22].mxu0 }
 0xbd9   : > { %v6264_v5 = vadd.f32 %v2574_v4, %v2356_v1  ;;  %v5161_v6 = vpop.f32.mrb[23].mxu0 }
 0xbda   : > { %v4759_v6 = vld [vmem:[%s6739_s2 + $0x28] sm:$0xff] }
 0xbdb   : > { %2803 = vrot.lane.b32.xlu1 %v6264_v5, %s6740_s26 }
 0xbe0   : > { %v2644_v9 = vpop.f32.mrb[24].mxu0 }
 0xbe1   : > { %v6269_v10 = vadd.f32 %v2644_v9, %v2360_v8  ;;  %v5172_v39 = vpop.f32.mrb[25].mxu0 }
 0xbe3   : > { %2880 = vrot.lane.b32.xlu0 %v6269_v10, %s6740_s26  ;;  %s673_s26 = scalar_lea.vmem [#allocation2], %s672_s29 }
 0xc3d   : > { %v2650_v11 = vpop.permute.xlu0 %2649 }
 0xc3e   : > { %5174 = vmatpush3.xpose.msk.msra.mxu1 %vm1064_vm5, %v2650_v11 }
 0xc3f   : > { %5178 = vmatprep.subr.mxu1 %v5701_v20 }
 0xc41   : > { %5176 = vmatmul.mubr.msk.f32.vlgmr.msra.gmra.mrb[18].mxu1 %vm1064_vm5, %v2435_v56 }
 0xc42   : > { %5180 = vmatprep.mubr.msk.f32.mxu1 %vm5700_vm1, %v5701_v20 }
 0xc45   : > { %v2727_v13 = vpop.permute.xlu1 %2726 }
 0xc46   : > { %5179 = vmatpush3.xpose.msk.msra.mxu1 %vm1064_vm5, %v2727_v13 }
 0xc47   : > { %5188 = vmatprep.subr.mxu1 %v5701_v20 }
 0xc49   : > { %5181 = vmatmul.mubr.msk.f32.vlgmr.msra.gmra.mrb[20].mxu1 %vm1064_vm5, %v2505_v62 }
 0xc4a   : > { %5190 = vmatprep.mubr.msk.f32.mxu1 %vm5700_vm1, %v5701_v20 }
 0xc4d   : > { %v2804_v57 = vpop.permute.xlu1 %2803 }
 0xc4e   : > { %5184 = vmatpush3.xpose.msk.msra.mxu0 %vm1064_vm5, %v2804_v57 }
 0xc4f   : > { %5193 = vmatprep.subr.mxu0 %v5701_v20 }
 0xc51   : > { %5186 = vmatmul.mubr.msk.f32.vlgmr.msra.gmra.mrb[26].mxu0 %vm1064_vm5, %v6264_v5 }
 0xc52   : > { %5195 = vmatprep.mubr.msk.f32.mxu0 %vm5700_vm1, %v5701_v20 }
 0xc55   : > { %v2881_v14 = vpop.permute.xlu0 %2880 }
 0xc56   : > { %5189 = vmatpush3.xpose.msk.msra.mxu1 %vm1064_vm5, %v2881_v14 }
 0xc57   : > { %5198 = vmatprep.subr.mxu1 %v5701_v20 }
 0xc59   : > { %5191 = vmatmul.mubr.msk.f32.vlgmr.msra.gmra.mrb[22].mxu1 %vm1064_vm5, %v6269_v10 }
 0xc5a   : > { %5200 = vmatprep.mubr.msk.f32.mxu1 %vm5700_vm1, %v5701_v20 }
 0xd14   : > { %v2721_v15 = vpop.f32.mrb[18].mxu1 }
 0xd15   : > { %v5177_v16 = vpop.f32.mrb[19].mxu1  ;;  %v2956_v17 = vsel %vm1370_vm6, %v2721_v15, -inf }
 0xd16   : > { %2957 = vmax.xlane.f32.xlu1 %v2956_v17 }
 0xd1c   : > { %v2798_v18 = vpop.f32.mrb[20].mxu1 }
 0xd1d   : > { %v5182_v19 = vpop.f32.mrb[21].mxu1  ;;  %v2959_v21 = vsel %vm1370_vm6, %v2798_v18, -inf }
 0xd1e   : > { %2960 = vmax.xlane.f32.xlu0 %v2959_v21 }
 0xd24   : > { %v2875_v22 = vpop.f32.mrb[26].mxu0 }
 0xd25   : > { %v5187_v23 = vpop.f32.mrb[27].mxu0  ;;  %v2962_v24 = vsel %vm1370_vm6, %v2875_v22, -inf }
 0xd26   : > { %2963 = vmax.xlane.f32.xlu0 %v2962_v24 }
 0xd2c   : > { %v2952_v25 = vpop.f32.mrb[22].mxu1 }
 0xd2d   : > { %v5192_v26 = vpop.f32.mrb[23].mxu1  ;;  %v2965_v27 = vsel %vm1370_vm6, %v2952_v25, -inf }
 0xd2e   : > { %2966 = vmax.xlane.f32.xlu1 %v2965_v27 }
 0xd3c   : > { %3000 = vrot.lane.b32.xlu0 %v2435_v56, %s6741_s22 }
 0xd3f   : > { %3077 = vrot.lane.b32.xlu1 %v2505_v62, %s6741_s22 }
 0xda3   : > { %v2958_v28 = vpop.xlane.xlu1 %2957 }
 0xda4   : > { %v2968_v29 = vsub.f32 %v2721_v15, %v2958_v28 }
 0xda6   : > { %v2972_v30 = vmul.f32 1.442695, %v2968_v29 }
 0xda8   : > { %5611 = vpow2.f32 %v2972_v30  ;;  %v4766_v30 = vld [vmem:[%s6677_s7 + $0x1] ss:$0 sm:$0xff] }
 0xdab   : > { %v2961_v31 = vpop.xlane.xlu0 %2960 }
 0xdac   : > { %v2969_v32 = vsub.f32 %v2798_v18, %v2961_v31 }
 0xdae   : > { %v2974_v33 = vmul.f32 1.442695, %v2969_v32 }
 0xdb0   : > { %5613 = vpow2.f32 %v2974_v33 }
 0xdb2   : > { %v5612_v34 = vpop.eup %5611 }
 0xdb3   : > { %v2964_v35 = vpop.xlane.xlu0 %2963  ;;  %v2980_v36 = vsel %vm1370_vm6, %v5612_v34, 0.0 }
 0xdb4   : > { %v2970_v37 = vsub.f32 %v2875_v22, %v2964_v35  ;;  %2981 = vadd.xlane.f32.xlu0 %v2980_v36 }
 0xdb6   : > { %v2976_v38 = vmul.f32 1.442695, %v2970_v37 }
 0xdb7   : > { %v3001_v40 = vpop.permute.xlu0 %3000 }
 0xdb8   : > { %5615 = vpow2.f32 %v2976_v38  ;;  %5194 = vmatpush3.msk.msra.mxu0 %vm1421_vm7, %v3001_v40 }
 0xdb9   : > { %5203 = vmatprep.subr.mxu0 %v5701_v20 }
 0xdba   : > { %v5614_v41 = vpop.eup %5613 }
 0xdbb   : > { %v2967_v42 = vpop.xlane.xlu1 %2966  ;;  %v2983_v43 = vsel %vm1370_vm6, %v5614_v41, 0.0 }
 0xdbc   : > { %v2971_v44 = vsub.f32 %v2952_v25, %v2967_v42  ;;  %2984 = vadd.xlane.f32.xlu1 %v2983_v43  ;;  %v4769_v42 = vld [vmem:[%s6680_s10 + $0x20] sm:$0xff]  ;;  %v4771_v43 = vld [vmem:[%s6680_s10 + $0x30] sm:$0xff] }
 0xdbe   : > { %v2978_v45 = vmul.f32 1.442695, %v2971_v44 }
 0xdbf   : > { %v3078_v46 = vpop.permute.xlu1 %3077 }
 0xdc0   : > { %5617 = vpow2.f32 %v2978_v45  ;;  %5199 = vmatpush3.msk.msra.mxu1 %vm1421_vm7, %v3078_v46  ;;  %v4772_v45 = vld [vmem:[%s6680_s10 + $0x38] sm:$0xff] }
 0xdc1   : > { %5208 = vmatprep.subr.mxu1 %v5701_v20  ;;  %v5456_v46 = vpack.c.bf16 %v4772_v45, %v4771_v43 }
 0xdc2   : > { %v5616_v2 = vpop.eup %5615 }
 0xdc3   : > { %v2986_v47 = vsel %vm1370_vm6, %v5616_v2, 0.0 }
 0xdc4   : > { %2987 = vadd.xlane.f32.xlu0 %v2986_v47 }
 0xdca   : > { %v5618_v48 = vpop.eup %5617 }
 0xdcb   : > { %v2989_v49 = vsel %vm1370_vm6, %v5618_v48, 0.0 }
 0xdcc   : > { %2990 = vadd.xlane.f32.xlu1 %v2989_v49 }
 0xdda   : > { %3231 = vrot.lane.b32.xlu0 %v6269_v10, %s6741_s22  ;;  %v4761_v10 = vld [vmem:[%s6739_s2 + $0x38] sm:$0xff] }
 0xddd   : > { %3154 = vrot.lane.b32.xlu1 %v6264_v5, %s6741_s22  ;;  %v4758_v5 = vld [vmem:[%s6739_s2 + $0x20] sm:$0xff]  ;;  %s4625_s22 = sshll.u32 %s673_s26, 4  ;;  %s6628_s2 = scalar_lea.hbm %s6744_s1, %s4801_s30  ;;  %s6630_s22 = int_to_ptr.vmem [resolvable:$true] %s4625_s22 }
 0xdde   : > { %s5635_s6 = scalar_lea.vmem %s6630_s22, 16 }
 0xddf   : > { %p5636_p11 = scmp.ne.s32.totalorder %s6630_s22, %s5635_s6 }
 0xde1   : > { %p5637_p12 = pnand %p5636_p11, %p5860_p5 }
 0xde3   : > { %p5638_p13 = pneg %p5637_p12 }
 0xe41   : > { %v2982_v50 = vpop.xlane.xlu0 %2981 }
 0xe42   : > { %5619 = vrcp.f32 %v2982_v50 }
 0xe49   : > { %v2985_v51 = vpop.xlane.xlu1 %2984 }
 0xe4a   : > { %5621 = vrcp.f32 %v2985_v51 }
 0xe4c   : > { %v5620_v52 = vpop.eup %5619 }
 0xe4d   : > { %v2993_v53 = vmul.f32 %v5620_v52, %v5612_v34 }
 0xe4f   : > { %5196 = vmatmul.mubr.msk.f32.vlgmr.msra.gmra.mrb[28].mxu0 %vm1417_vm8, %v2993_v53 }
 0xe50   : > { %5205 = vmatprep.mubr.msk.f32.mxu0 %vm5700_vm1, %v5701_v20 }
 0xe51   : > { %v2988_v56 = vpop.xlane.xlu0 %2987 }
 0xe52   : > { %5623 = vrcp.f32 %v2988_v56 }
 0xe54   : > { %v5622_v58 = vpop.eup %5621 }
 0xe55   : > { %v2995_v59 = vmul.f32 %v5622_v58, %v5614_v41  ;;  %v3232_v60 = vpop.permute.xlu0 %3231  ;;  %v4767_v58 = vld [vmem:[%s6678_s8 + $0x1] ss:$0 sm:$0xff] }
 0xe57   : > { %5201 = vmatmul.mubr.msk.f32.vlgmr.msra.gmra.mrb[24].mxu1 %vm1417_vm8, %v2995_v59 }
 0xe58   : > { %5209 = vmatpush3.msk.msra.mxu1 %vm1421_vm7, %v3232_v60  ;;  %5210 = vmatprep.mubr.msk.f32.mxu1 %vm5700_vm1, %v5701_v20  ;;  %v4768_v60 = vld [vmem:[%s6679_s9 + $0x1] ss:$0 sm:$0xff] }
 0xe59   : > { %v2991_v61 = vpop.xlane.xlu1 %2990  ;;  %5218 = vmatprep.subr.mxu1 %v5701_v20 }
 0xe5a   : > { %5625 = vrcp.f32 %v2991_v61 }
 0xe5c   : > { %v5624_v62 = vpop.eup %5623 }
 0xe5d   : > { %v2997_v63 = vmul.f32 %v5624_v62, %v5616_v2  ;;  %v3155_v0 = vpop.permute.xlu1 %3154 }
 0xe5e   : > { %5204 = vmatpush3.msk.msra.mxu0 %vm1421_vm7, %v3155_v0  ;;  %v4776_v0 = vld [vmem:[%s6682_s12 + $0x88] sm:$0xff] }
 0xe5f   : > { %5206 = vmatmul.mubr.msk.f32.vlgmr.msra.gmra.mrb[30].mxu0 %vm1417_vm8, %v2997_v63  ;;  %5213 = vmatprep.subr.mxu0 %v5701_v20  ;;  %v4775_v63 = vld [vmem:[%s6682_s12 + $0x80] sm:$0xff] }
 0xe60   : > { %5215 = vmatprep.mubr.msk.f32.mxu0 %vm5700_vm1, %v5701_v20  ;;  %5214 = vmatpush3.msra.mxu0 %v4758_v5  ;;  %v4778_v5 = vld [vmem:[%s6682_s12 + $0x98] sm:$0xff] }
 0xe61   : > { %5223 = vmatprep.subr.mxu0 %v5701_v20 }
 0xe64   : > { %v5626_v1 = vpop.eup %5625 }
 0xe65   : > { %v2999_v4 = vmul.f32 %v5626_v1, %v5618_v48  ;;  %v5459_v1 = vpack.c.bf16 %v4776_v0, %v4775_v63  ;;  %v3858_v63 = vld [vmem:[%s6684_s14 + $0x18] sm:$0xff] }
 0xe67   : > { %5211 = vmatmul.mubr.msk.f32.vlgmr.msra.gmra.mrb[26].mxu1 %vm1417_vm8, %v2999_v4  ;;  %v4777_v4 = vld [vmem:[%s6682_s12 + $0x90] sm:$0xff] }
 0xe68   : > { %5220 = vmatprep.mubr.msk.f32.mxu1 %vm5700_vm1, %v5701_v20  ;;  %5219 = vmatpush3.msra.mxu1 %v4759_v6  ;;  %v5462_v6 = vpack.c.bf16 %v4778_v5, %v4777_v4  ;;  %v3874_v4 = vld [vmem:[%s6684_s14 + $0x98] sm:$0xff] }
 0xe69   : > { %5228 = vmatprep.subr.mxu1 %v5701_v20 }
 0xf22   : > { %v3073_v8 = vpop.f32.mrb[28].mxu0 }
 0xf23   : > { %v5197_v9 = vpop.f32.mrb[29].mxu0  ;;  %5216 = vmatmul.mubr.msk.f32.vlgmr.msra.gmra.mrb[32].mxu0 %vm1064_vm5, %v3073_v8  ;;  %v4780_v8 = vld [vmem:[%s6682_s12 + $0xa8] sm:$0xff] }
 0xf24   : > { %5224 = vmatpush3.msra.mxu0 %v4760_v7  ;;  %5225 = vmatprep.mubr.msk.f32.mxu0 %vm5700_vm1, %v5701_v20  ;;  %v4779_v7 = vld [vmem:[%s6682_s12 + $0xa0] sm:$0xff] }
 0xf25   : > { %5452 = vmatprep.subr.bf16.mxu0 %v5699_v12  ;;  %v5465_v9 = vpack.c.bf16 %v4780_v8, %v4779_v7  ;;  %v4791_v7 = vld [vmem:[%s6683_s13 + $0x1] ss:$0 sm:$0xff] }
 0xf2a   : > { %v3150_v39 = vpop.f32.mrb[24].mxu1 }
 0xf2b   : > { %v5202_v11 = vpop.f32.mrb[25].mxu1  ;;  %5221 = vmatmul.mubr.msk.f32.vlgmr.msra.gmra.mrb[28].mxu1 %vm1064_vm5, %v3150_v39  ;;  %v4782_v39 = vld [vmem:[%s6682_s12 + $0xb8] sm:$0xff] }
 0xf2c   : > { %5229 = vmatpush3.msra.mxu1 %v4761_v10  ;;  %5230 = vmatprep.mubr.msk.f32.mxu1 %vm5700_vm1, %v5701_v20  ;;  %v4781_v10 = vld [vmem:[%s6682_s12 + $0xb0] sm:$0xff] }
 0xf2d   : > { %5458 = vmatprep.subr.bf16.mxu1 %v5699_v12  ;;  %v5468_v11 = vpack.c.bf16 %v4782_v39, %v4781_v10  ;;  %v3859_v39 = vld [vmem:[%s6684_s14 + $0x20] sm:$0xff] }
 0xf32   : > { %v3227_v13 = vpop.f32.mrb[30].mxu0 }
 0xf33   : > { %v5207_v57 = vpop.f32.mrb[31].mxu0  ;;  %5226 = vmatmul.mubr.msk.f32.vlgmr.msra.gmra.mrb[34].mxu0 %vm1064_vm5, %v3227_v13  ;;  %v4783_v13 = vld [vmem:[%s6682_s12 + $0xc0] sm:$0xff] }
 0xf34   : > { %5241 = vmatprep.mubr.msk.f32.mxu0 %vm5700_vm1, %v5701_v20  ;;  %v4784_v57 = vld [vmem:[%s6682_s12 + $0xc8] sm:$0xff] }
 0xf3a   : > { %v3304_v14 = vpop.f32.mrb[26].mxu1 }
 0xf3b   : > { %v5212_v15 = vpop.f32.mrb[27].mxu1  ;;  %5231 = vmatmul.mubr.msk.f32.vlgmr.msra.gmra.mrb[30].mxu1 %vm1064_vm5, %v3304_v14  ;;  %v5471_v14 = vpack.c.bf16 %v4784_v57, %v4783_v13 }
 0xf3c   : > { %5276 = vmatprep.mubr.msk.f32.mxu1 %vm5700_vm1, %v5701_v20  ;;  %5460 = vmatpush3.bf16.msra.mxu1 %v5459_v1  ;;  %v4785_v15 = vld [vmem:[%s6682_s12 + $0xd0] sm:$0xff] }
 0xf3d   : > { %5461 = vmatprep.subr.bf16.mxu1 %v5699_v12  ;;  %v3873_v1 = vld [vmem:[%s6684_s14 + $0x90] sm:$0xff] }
 0xf3e   : > { %v5510_v5 = vpack.c.bf16 %v3874_v4, %v3873_v1 }
 0xf40   : > { %5463 = vmatpush3.bf16.msra.mxu1 %v5462_v6 }
 0xf41   : > { %5464 = vmatprep.subr.bf16.mxu1 %v5699_v12 }
 0xf44   : > { %5466 = vmatpush3.bf16.msra.mxu1 %v5465_v9 }
 0xf45   : > { %5467 = vmatprep.subr.bf16.mxu1 %v5699_v12 }
 0xf48   : > { %5469 = vmatpush3.bf16.msra.mxu1 %v5468_v11  ;;  %v3860_v11 = vld [vmem:[%s6684_s14 + $0x28] sm:$0xff] }
 0xf49   : > { %5470 = vmatprep.subr.bf16.mxu1 %v5699_v12 }
 0xf4c   : > { %5472 = vmatpush3.bf16.msra.mxu1 %v5471_v14  ;;  %v5489_v14 = vpack.c.bf16 %v3860_v11, %v3859_v39  ;;  %v3879_v11 = vld [vmem:[%s6685_s15] sm:$0x1] }
 0xf4d   : > { %5473 = vmatprep.subr.bf16.mxu1 %v5699_v12 }
 0xff6   : > { %v3382_v16 = vpop.f32.mrb[32].mxu0 }
 0xff7   : > { %v5217_v17 = vpop.f32.mrb[33].mxu0  ;;  %v3605_v19 = vsel %vm683_vm0, %v3382_v16, 0.0  ;;  %v4786_v16 = vld [vmem:[%s6682_s12 + $0xd8] sm:$0xff] }
 0xff8   : > { %v5474_v17 = vpack.c.bf16 %v4786_v16, %v4785_v15 }
 0xffa   : > { %5475 = vmatpush3.bf16.msra.mxu1 %v5474_v17  ;;  %v3862_v17 = vld [vmem:[%s6684_s14 + $0x38] sm:$0xff] }
 0xffb   : > { %5476 = vmatprep.subr.bf16.mxu1 %v5699_v12 }
 0xffe   : > { %v3455_v18 = vpop.f32.mrb[28].mxu1 }
 0xfff   : > { %v3606_v21 = vsel %vm683_vm0, %v3455_v18, 0.0  ;;  %v5222_v22 = vpop.f32.mrb[29].mxu1  ;;  %v4787_v18 = vld [vmem:[%s6682_s12 + $0xe0] sm:$0xff] }
0x1000   : > { %v3607_v23 = vadd.f32 %v3606_v21, %v3605_v19  ;;  %v4788_v19 = vld [vmem:[%s6682_s12 + $0xe8] sm:$0xff]  ;;  %v4789_v22 = vld [vmem:[%s6682_s12 + $0xf0] sm:$0xff] }
0x1001   : > { %v5477_v21 = vpack.c.bf16 %v4788_v19, %v4787_v18 }
0x1003   : > { %5478 = vmatpush3.bf16.msra.mxu1 %v5477_v21 }
0x1004   : > { %5479 = vmatprep.subr.bf16.mxu1 %v5699_v12 }
0x1006   : > { %v3528_v24 = vpop.f32.mrb[34].mxu0 }
0x1007   : > { %v3608_v25 = vsel %vm683_vm0, %v3528_v24, 0.0  ;;  %v5227_v26 = vpop.f32.mrb[35].mxu0 }
0x1008   : > { %v3609_v27 = vadd.f32 %v3608_v25, %v3607_v23  ;;  %v4790_v23 = vld [vmem:[%s6682_s12 + $0xf8] sm:$0xff]  ;;  %v4773_v25 = vld [vmem:[%s6681_s11 + $0x1] ss:$0 sm:$0xff] }
0x1009   : > { %v5480_v24 = vpack.c.bf16 %v4790_v23, %v4789_v22  ;;  %v3863_v22 = vld [vmem:[%s6684_s14 + $0x40] sm:$0xff]  ;;  %v3864_v23 = vld [vmem:[%s6684_s14 + $0x48] sm:$0xff] }
0x100b   : > { %5481 = vmatpush3.bf16.msra.mxu1 %v5480_v24  ;;  %v5495_v24 = vpack.c.bf16 %v3864_v23, %v3863_v22 }
0x100c   : > { %5506 = vmatprep.subr.bf16.mxu1 %v5699_v12 }
0x100e   : > { %v3601_v28 = vpop.f32.mrb[30].mxu1 }
0x100f   : > { %v3610_v29 = vsel %vm683_vm0, %v3601_v28, 0.0  ;;  %v5232_v31 = vpop.f32.mrb[31].mxu1 }
0x1010   : > { %v3611_v32 = vadd.f32 %v3610_v29, %v3609_v27 }
0x1012   : > { %v3617_v33 = vadd.f32 %v4766_v30, %v3611_v32 }
0x1014   : > { %v6365_v34 = vadd.f32 %v3617_v33, %v6174_v3  ;;  %v4770_v3 = vld [vmem:[%s6680_s10 + $0x28] sm:$0xff] }
0x1015   : > { %v5453_v44 = vpack.c.bf16 %v4770_v3, %v4769_v42 }
0x1016   : > { %v3621_v35 = vsel %vm683_vm0, %v6365_v34, 0.0 }
0x1017   : > { %3622 = vadd.xlane.f32.xlu1 %v3621_v35  ;;  %5454 = vmatpush3.bf16.msra.mxu0 %v5453_v44 }
0x1018   : > { %5455 = vmatprep.subr.bf16.mxu0 %v5699_v12 }
0x101b   : > { %5457 = vmatpush3.bf16.msra.mxu0 %v5456_v46 }
0x101c   : > { %5482 = vmatprep.subr.bf16.mxu0 %v5699_v12 }
0x10a4   : > { %v3623_v36 = vpop.xlane.xlu1 %3622 }
0x10a5   : > { %v3624_v37 = vmul.f32 0.03125, %v3623_v36 }
0x10a7   : > { %v3625_v38 = vsub.f32 %v6365_v34, %v3624_v37 }
0x10a9   : > { %v3626_v40 = vmul.f32 %v3625_v38, %v3625_v38 }
0x10ab   : > { %v3627_v41 = vsel %vm683_vm0, %v3626_v40, 0.0 }
0x10ac   : > { %3628 = vadd.xlane.f32.xlu0 %v3627_v41 }
0x1139   : > { %v3629_v2 = vpop.xlane.xlu0 %3628 }
0x113a   : > { %v3630_v47 = vmul.f32 0.03125, %v3629_v2 }
0x113c   : > { %v3631_v48 = vadd.f32 1e-05, %v3630_v47 }
0x113e   : > { %5627 = vrsqrt.f32 %v3631_v48  ;;  %vm3634_vm14 = vcmp.eq.f32.partialorder %v3631_v48, inf  ;;  %v3637_v51 = vand.u32 2147483648, %v3631_v48  ;;  %vm3636_vm15 = vcmp.eq.f32.partialorder %v3631_v48, 0.0 }
0x1148   : > { %v5628_v49 = vpop.eup %5627 }
0x1149   : > { %v3633_v50 = vmul.f32 %v5628_v49, %v3631_v48 }
0x114b   : > { %v3635_v52 = vsel %vm3634_vm14, %v3631_v48, %v3633_v50 }
0x114c   : > { %v3638_v53 = vsel %vm3636_vm15, %v3637_v51, %v3635_v52 }
0x114d   : > { %5629 = vrcp.f32 %v3638_v53 }
0x1157   : > { %v5630_v56 = vpop.eup %5629 }
0x1158   : > { %v3640_v59 = vmul.f32 %v5630_v56, %v3625_v38  ;;  %v3855_v56 = vld [vmem:[%s6684_s14] sm:$0xff] }
0x115a   : > { %v3645_v61 = vmul.f32 %v4767_v58, %v3640_v59  ;;  %v3856_v58 = vld [vmem:[%s6684_s14 + $0x8] sm:$0xff] }
0x115b   : > { %v5483_v59 = vpack.c.bf16 %v3856_v58, %v3855_v56 }
0x115c   : > { %v3650_v62 = vadd.f32 %v4768_v60, %v3645_v61  ;;  %v3872_v60 = vld [vmem:[%s6684_s14 + $0x88] sm:$0xff] }
0x115e   : > { %5242 = vmatmul.mubr.msk.f32.vlgmr.msra.gmra.mrb[36].mxu0 %vm777_vm4, %v3650_v62  ;;  %v3857_v62 = vld [vmem:[%s6684_s14 + $0x10] sm:$0xff] }
0x115f   : > { %5287 = vmatprep.mubr.msk.f32.mxu0 %vm5700_vm1, %v5701_v20  ;;  %5484 = vmatpush3.bf16.msra.mxu0 %v5483_v59  ;;  %v5486_v0 = vpack.c.bf16 %v3858_v63, %v3857_v62 }
0x1160   : > { %5485 = vmatprep.subr.bf16.mxu0 %v5699_v12 }
0x1163   : > { %5487 = vmatpush3.bf16.msra.mxu0 %v5486_v0 }
0x1164   : > { %5488 = vmatprep.subr.bf16.mxu0 %v5699_v12 }
0x1231   : > { %v3730_v26 = vpop.f32.mrb[36].mxu0 }
0x1232   : > { %v3731_v27 = vadd.f32 %v4773_v25, %v3730_v26  ;;  %v5243_v28 = vpop.f32.mrb[37].mxu0  ;;  %v3865_v26 = vld [vmem:[%s6684_s14 + $0x50] sm:$0xff] }
0x1234   : > { %v3735_v29 = vmul.f32 0.70710677, %v3731_v27  ;;  %v3734_v51 = vmul.f32 0.5, %v3731_v27  ;;  %v3866_v27 = vld [vmem:[%s6684_s14 + $0x58] sm:$0xff] }
0x1235   : > { %v5498_v28 = vpack.c.bf16 %v3866_v27, %v3865_v26  ;;  %v4457_v27 = vld [vmem:[%s6689_s19] sm:$0x1] }
0x1236   : > { %v3738_v30 = vand.u32 2147483647, %v3735_v29  ;;  %vm3736_vm0 = vcmp.ge.f32.partialorder %v3735_v29, 0.0  ;;  %v3867_v29 = vld [vmem:[%s6684_s14 + $0x60] sm:$0xff] }
0x1237   : > { %v3737_v49 = vsel %vm3736_vm0, 1.0, %v5705_v55  ;;  %v3871_v55 = vld [vmem:[%s6684_s14 + $0x80] sm:$0xff] }
0x1238   : > { %v3739_v31 = vmul.f32 0.3275911, %v3738_v30  ;;  %v3752_v33 = vsub.f32 0.0, %v3738_v30  ;;  %v5507_v61 = vpack.c.bf16 %v3872_v60, %v3871_v55 }
0x123a   : > { %v3740_v32 = vadd.f32 1.0, %v3739_v31  ;;  %v3753_v36 = vmul.f32 %v3752_v33, %v3738_v30  ;;  %v3868_v30 = vld [vmem:[%s6684_s14 + $0x68] sm:$0xff]  ;;  %v3869_v33 = vld [vmem:[%s6684_s14 + $0x70] sm:$0xff] }
0x123b   : > { %v5501_v31 = vpack.c.bf16 %v3868_v30, %v3867_v29 }
0x123c   : > { %5631 = vrcp.f32 %v3740_v32  ;;  %v3754_v40 = vmul.f32 1.442695, %v3753_v36 }
0x123e   : > { %5633 = vpow2.f32 %v3754_v40 }
0x1246   : > { %v5632_v35 = vpop.eup %5631 }
0x1247   : > { %v3743_v37 = vmul.f32 1.0614054, %v5632_v35 }
0x1248   : > { %v5634_v2 = vpop.eup %5633 }
0x1249   : > { %v3744_v38 = vadd.f32 -1.4531521, %v3743_v37  ;;  %v3875_v37 = vld [vmem:[%s6684_s14 + $0xa0] sm:$0xff] }
0x124b   : > { %v3745_v41 = vmul.f32 %v5632_v35, %v3744_v38  ;;  %v3876_v38 = vld [vmem:[%s6684_s14 + $0xa8] sm:$0xff] }
0x124c   : > { %v5513_v40 = vpack.c.bf16 %v3876_v38, %v3875_v37 }
0x124d   : > { %v3746_v42 = vadd.f32 1.4214138, %v3745_v41 }
0x124f   : > { %v3747_v3 = vmul.f32 %v5632_v35, %v3746_v42  ;;  %v3877_v42 = vld [vmem:[%s6684_s14 + $0xb0] sm:$0xff] }
0x1251   : > { %v3748_v43 = vadd.f32 -0.28449672, %v3747_v3  ;;  %v3878_v3 = vld [vmem:[%s6684_s14 + $0xb8] sm:$0xff] }
0x1253   : > { %v3749_v44 = vmul.f32 %v5632_v35, %v3748_v43  ;;  %v5516_v43 = vpack.c.bf16 %v3878_v3, %v3877_v42 }
0x1255   : > { %v3750_v45 = vadd.f32 0.2548296, %v3749_v44 }
0x1257   : > { %v3751_v46 = vmul.f32 %v5632_v35, %v3750_v45  ;;  %v3870_v35 = vld [vmem:[%s6684_s14 + $0x78] sm:$0xff] }
0x1258   : > { %v5504_v36 = vpack.c.bf16 %v3870_v35, %v3869_v33 }
0x1259   : > { %v3756_v47 = vmul.f32 %v5634_v2, %v3751_v46  ;;  %v4374_v46 = vld [vmem:[%s6686_s16] sm:$0xff]  ;;  %v4375_v2 = vld [vmem:[%s6686_s16 + $0x8] sm:$0xff] }
0x125b   : > { %v3757_v48 = vsub.f32 1.0, %v3756_v47  ;;  %v5519_v47 = vpack.c.bf16 %v4375_v2, %v4374_v46 }
0x125d   : > { %v3758_v50 = vmul.f32 %v3757_v48, %v3737_v49  ;;  %v4377_v48 = vld [vmem:[%s6686_s16 + $0x18] sm:$0xff] }
0x125f   : > { %v3759_v52 = vadd.f32 1.0, %v3758_v50  ;;  %v4453_v50 = vld [vmem:[%s6688_s18] sm:$0xff] }
0x1261   : > { %v3760_v53 = vmul.f32 %v3759_v52, %v3734_v51  ;;  %v4454_v51 = vld [vmem:[%s6688_s18 + $0x8] sm:$0xff] }
0x1262   : > { %v5525_v52 = vpack.c.bf16 %v4454_v51, %v4453_v50 }
0x1263   : > { %5277 = vmatmul.mubr.f32.vlgmr.msra.gmra.mrb[32].mxu1 %v3760_v53 }
0x1264   : > { %5331 = vmatprep.mubr.msk.f32.mxu1 %vm5700_vm1, %v5701_v20  ;;  %5508 = vmatpush3.bf16.msra.mxu1 %v5507_v61 }
0x1265   : > { %5509 = vmatprep.subr.bf16.mxu1 %v5699_v12 }
0x1268   : > { %5511 = vmatpush3.bf16.msra.mxu1 %v5510_v5 }
0x1269   : > { %5518 = vmatprep.subr.bf16.mxu1 %v5699_v12 }
0x1336   : > { %v3844_v6 = vpop.f32.mrb[32].mxu1 }
0x1337   : > { %v3848_v8 = vadd.f32 %v3844_v6, %v6365_v34  ;;  %v5278_v9 = vpop.f32.mrb[33].mxu1  ;;  %v3861_v34 = vld [vmem:[%s6684_s14 + $0x30] sm:$0xff] }
0x1338   : > { %v5492_v19 = vpack.c.bf16 %v3862_v17, %v3861_v34  ;;  %v4455_v34 = vld [vmem:[%s6688_s18 + $0x10] sm:$0xff]  ;;  %v4456_v17 = vld [vmem:[%s6688_s18 + $0x18] sm:$0xff] }
0x1339   : > { %v3854_v10 = vadd.f32 %v4791_v7, %v3848_v8 }
0x133b   : > { %v3881_v13 = vcombine.high %v3854_v10, %v3854_v10  ;;  %v3888_v57 = vrot.slane %v3854_v10, %v5964_v54 }
0x133d   : > { %v3895_v15 = vrot.slane %v3881_v13, %v5964_v54  ;;  %v3904_v16 = vrot.slane %v3888_v57, %v5964_v54  ;;  %v3896_v21 = vcombine.high %v3888_v57, %v3888_v57 }
0x133f   : > { %v3911_v18 = vrot.slane %v3895_v15, %v5964_v54  ;;  %5288 = vmatmul.mubr.msk.f32.vlgmr.msra.gmra.mrb[38].mxu0 %vm777_vm4, %v3904_v16  ;;  %v3918_v25 = vrot.slane %v3896_v21, %v5964_v54  ;;  %v3926_v32 = vcombine.high %v3904_v16, %v3904_v16  ;;  %v3897_v44 = vcombine.high %v3895_v15, %v3895_v15 }
0x1340   : > { %5490 = vmatpush3.bf16.msra.mxu0 %v5489_v14  ;;  %5298 = vmatprep.mubr.msk.f32.mxu0 %vm5700_vm1, %v5701_v20 }
0x1341   : > { %5332 = vmatmul.mubr.msk.f32.vlgmr.msra.gmra.mrb[34].mxu1 %vm777_vm4, %v3911_v18  ;;  %5491 = vmatprep.subr.bf16.mxu0 %v5699_v12  ;;  %v3927_v41 = vcombine.high %v3918_v25, %v3918_v25  ;;  %v3925_v45 = vrot.slane %v3897_v44, %v5964_v54  ;;  %v4376_v54 = vld [vmem:[%s6686_s16 + $0x10] sm:$0xff]  ;;  %v5528_v18 = vpack.c.bf16 %v4456_v17, %v4455_v34 }
0x1342   : > { %5353 = vmatprep.mubr.msk.f32.mxu1 %vm5700_vm1, %v5701_v20  ;;  %5520 = vmatpush3.bf16.msra.mxu1 %v5519_v47  ;;  %v5522_v49 = vpack.c.bf16 %v4377_v48, %v4376_v54 }
0x1343   : > { %5521 = vmatprep.subr.bf16.mxu1 %v5699_v12 }
0x1344   : > { %5493 = vmatpush3.bf16.msra.mxu0 %v5492_v19  ;;  %v4378_v19 = vld [vmem:[%s6687_s17] sm:$0x1] }
0x1345   : > { %5494 = vmatprep.subr.bf16.mxu0 %v5699_v12 }
0x1346   : > { %5523 = vmatpush3.bf16.msra.mxu1 %v5522_v49 }
0x1347   : > { %5299 = vmatmul.mubr.msk.f32.vlgmr.msra.gmra.mrb[40].mxu0 %vm777_vm4, %v3918_v25  ;;  %5530 = vmatprep.subr.bf16.mxu1 %v5699_v12  ;;  %v4533_v25 = vld [vmem:[%s6690_s20 + $0x8] sm:$0xff] }
0x1348   : > { %5496 = vmatpush3.bf16.msra.mxu0 %v5495_v24  ;;  %5309 = vmatprep.mubr.msk.f32.mxu0 %vm5700_vm1, %v5701_v20 }
0x1349   : > { %5497 = vmatprep.subr.bf16.mxu0 %v5699_v12 }
0x134c   : > { %5499 = vmatpush3.bf16.msra.mxu0 %v5498_v28 }
0x134d   : > { %5500 = vmatprep.subr.bf16.mxu0 %v5699_v12 }
0x134f   : > { %5310 = vmatmul.mubr.msk.f32.vlgmr.msra.gmra.mrb[42].mxu0 %vm777_vm4, %v3926_v32  ;;  %v4534_v32 = vld [vmem:[%s6742_s23] sm:$0x1]  ;;  %s5639_s23 = sshll.u32 %s5706_s4, 4  ;;  %s5640_s23 = int_to_ptr.vmem [resolvable:$false] %s5639_s23 }
0x1350   : > { %5502 = vmatpush3.bf16.msra.mxu0 %v5501_v31  ;;  %5320 = vmatprep.mubr.msk.f32.mxu0 %vm5700_vm1, %v5701_v20  ;;  %s5641_s5 = scalar_lea.vmem %s5640_s23, 32  ;;  %p5642_p0 = scmp.lt.s32.totalorder %s6630_s22, %s5640_s23 }
0x1351   : > { %5503 = vmatprep.subr.bf16.mxu0 %v5699_v12  ;;  %p5643_p1 = scmp.lt.s32.totalorder %s5641_s5, %s5635_s6 }
0x1353   : > { %p5644_p2 = por %p5643_p1, %p5642_p0 }
0x1354   : > { %5505 = vmatpush3.bf16.msra.mxu0 %v5504_v36 }
0x1355   : > { %5512 = vmatprep.subr.bf16.mxu0 %v5699_v12  ;;  %p5645_p3 = pnand %p5644_p2, %p5638_p13 }
0x1357   : > { %5321 = vmatmul.mubr.msk.f32.vlgmr.msra.gmra.mrb[44].mxu0 %vm777_vm4, %v3927_v41 }
0x1358   : > { %5514 = vmatpush3.bf16.msra.mxu0 %v5513_v40  ;;  %5342 = vmatprep.mubr.msk.f32.mxu0 %vm5700_vm1, %v5701_v20 }
0x1359   : > { %5515 = vmatprep.subr.bf16.mxu0 %v5699_v12 }
0x135c   : > { %5517 = vmatpush3.bf16.msra.mxu0 %v5516_v43 }
0x135d   : > { %5524 = vmatprep.subr.bf16.mxu0 %v5699_v12 }
0x135f   : > { %5343 = vmatmul.mubr.msk.f32.vlgmr.msra.gmra.mrb[46].mxu0 %vm777_vm4, %v3925_v45 }
0x1360   : > { %5364 = vmatprep.mubr.msk.f32.mxu0 %vm5700_vm1, %v5701_v20  ;;  %5526 = vmatpush3.bf16.msra.mxu0 %v5525_v52 }
0x1361   : > { %5527 = vmatprep.subr.bf16.mxu0 %v5699_v12 }
0x1364   : > { %5529 = vmatpush3.bf16.msra.mxu0 %v5528_v18 }
0x1412   : > { %v3996_v53 = vpop.f32.mrb[38].mxu0 }
0x1413   : > { %v5289_v56 = vpop.f32.mrb[39].mxu0  ;;  %v4361_v60 = vsel %vm4360_vm2, %v3996_v53, 0.0 }
0x1414   : > { %v4284_v58 = vpop.f32.mrb[34].mxu1 }
0x1415   : > { %v5333_v59 = vpop.f32.mrb[35].mxu1  ;;  %v4368_v9 = vsel %vm4360_vm2, %v4284_v58, 0.0 }
0x141a   : > { %v4068_v55 = vpop.f32.mrb[40].mxu0 }
0x141b   : > { %v4362_v61 = vsel %vm4360_vm2, %v4068_v55, 0.0  ;;  %v5300_v62 = vpop.f32.mrb[41].mxu0 }
0x141c   : > { %v4363_v63 = vadd.f32 %v4362_v61, %v4361_v60 }
0x1422   : > { %v4140_v0 = vpop.f32.mrb[42].mxu0 }
0x1423   : > { %v4364_v1 = vsel %vm4360_vm2, %v4140_v0, 0.0  ;;  %v5311_v4 = vpop.f32.mrb[43].mxu0 }
0x1424   : > { %v4365_v5 = vadd.f32 %v4364_v1, %v4363_v63 }
0x142a   : > { %v4212_v6 = vpop.f32.mrb[44].mxu0 }
0x142b   : > { %v4366_v12 = vsel %vm4360_vm2, %v4212_v6, 0.0  ;;  %v5322_v7 = vpop.f32.mrb[45].mxu0 }
0x142c   : > { %v4367_v8 = vadd.f32 %v4366_v12, %v4365_v5 }
0x142e   : > { %v4369_v10 = vadd.f32 %v4368_v9, %v4367_v8 }
0x1432   : > { %v4356_v39 = vpop.f32.mrb[46].mxu0 }
0x1433   : > { %v4370_v13 = vsel %vm4360_vm2, %v4356_v39, 0.0  ;;  %v5344_v57 = vpop.f32.mrb[47].mxu0 }
0x1434   : > { %v4371_v14 = vadd.f32 %v4370_v13, %v4369_v10 }
0x1436   : > { %v4372_v15 = vadd.f32 %v4371_v14, %v3879_v11 }
0x1438   : > { %v4373_v16 = vmax.f32 %v4372_v15, 0.0 }
0x143a   : > { %5354 = vmatmul.mubr.msk.f32.vlgmr.msra.gmra.mrb[36].mxu1 %vm777_vm4, %v4373_v16 }
0x143b   : > { %5371 = vmatprep.mubr.msk.f32.mxu1 %vm5700_vm1, %v5701_v20  ;;  %v4532_v20 = vld [vmem:[%s6690_s20] sm:$0xff]  ;;  %vm4535_vm1 = vcmask 130048  }
0x143c   : > { %v5531_v26 = vpack.c.bf16 %v4533_v25, %v4532_v20 }
0x143e   : > { %5532 = vmatpush3.bf16.msra.mxu1 %v5531_v26 }
0x150d   : > { %v4448_v21 = vpop.f32.mrb[36].mxu1 }
0x150e   : > { %v4449_v22 = vadd.f32 %v4448_v21, %v4378_v19  ;;  %v5355_v23 = vpop.f32.mrb[37].mxu1 }
0x1510   : > { %v4452_v24 = vmax.f32 %v4449_v22, 0.0 }
0x1512   : > { %5365 = vmatmul.mubr.msk.f32.vlgmr.msra.gmra.mrb[48].mxu0 %vm777_vm4, %v4452_v24 }
0x15e5   : > { %v4527_v28 = vpop.f32.mrb[48].mxu0 }
0x15e6   : > { %v4528_v29 = vadd.f32 %v4527_v28, %v4457_v27  ;;  %v5366_v30 = vpop.f32.mrb[49].mxu0 }
0x15e8   : > { %v4531_v31 = vmax.f32 %v4528_v29, 0.0 }
0x15ea   : > { %5372 = vmatmul.mubr.msk.f32.vlgmr.msra.gmra.mrb[38].mxu1 %vm4535_vm1, %v4531_v31 }
0x16bd   : > { %v4605_v33 = vpop.f32.mrb[38].mxu1 }
0x16be   : > { %v4606_v35 = vadd.f32 %v4605_v33, %v4534_v32  ;;  %v5373_v36 = vpop.f32.mrb[39].mxu1 }
0x16c0   : > { %v4609_v37 = vmax.f32 %v4606_v35, 0.0 }
0x16c2   : > { %4611 = vst.msk [vmem:[%s673_s26] sm:$0x1] %vm4610_vm3, %v4609_v37 }
0x16c3   : > { %5648 = shalt.err (!%p5645_p3)
}
0x16c4   : > { %s5649_s29 = scalar_lea.hbm %s6628_s2, 16  ;;  %s5653_s0 = scalar_lea.hbm %s6744_s1, 32 }
0x16c5   : > { %p5650_p4 = scmp.ne.s32.totalorder %s6628_s2, %s5649_s29  ;;  %p5654_p9 = scmp.lt.u32.totalorder %s6628_s2, %s6744_s1 }
0x16c6   : > { %p5655_p10 = scmp.lt.u32.totalorder %s5653_s0, %s5649_s29  ;;  %p5657_p12 = scmp.lt.u32.totalorder %s5649_s29, %s6628_s2 }
0x16c7   : > { %p5651_p7 = pnand %p5650_p4, %p5860_p5 }
0x16c8   : > { %p5656_p11 = por %p5655_p10, %p5654_p9 }
0x16c9   : > { %p5652_p8 = pneg %p5651_p7 }
0x16ca   : > { %p5658_p13 = por %p5657_p12, %p5656_p11 }
0x16cc   : > { %p5659_p0 = pnand %p5658_p13, %p5652_p8 }
0x16ce   : > { %5662 = shalt.err (!%p5659_p0)
}
0x16cf   : > { %5533 = dma.vmem_to_hbm [thread:$0]  (%p5860_p5), %s6630_s22, 16, %s6628_s2, %s4613_s21  }
0x16d0 PF: > { %s6745_s5 = sld [smem:[#allocation7_spill]]  ;;  %s6746_s6 = sld [smem:[#allocation5_spill]] }
0x16d6   : > { %p5539_p1 = scmp.ge.s32.totalorder %s6745_s5, 2  ;;  %s4637_s30 = sand.u32 1, %s6746_s6  }
0x16d7   : > { %s4638_s26 = scalar_lea.sflag [#allocation3], %s4637_s30 }
0x16d8   : > { %p5536_p2 = pnand %p5539_p1, %p5864_p6 }
0x16da   : > { %5680 = dma.done.wait (!%p5536_p2), %s4638_s26, 16  }
0x16db   : > { %5682 = vsyncadd (!%p5536_p2), %s4638_s26, 4294967280  ;;  %s6748_s30 = sld [smem:[#allocation8_spill]]  ;;  %s6749_s29 = sld [smem:[#allocation6_spill]] }
0x16dc   : > { %s6750_s0 = sld [smem:[#allocation9_spill]]  ;;  %s6751_s3 = smov %s5689_s28 }
0x16e1   : > { %p32_p3 = scmp.ge.s32.totalorder %s6748_s30, 4   ;;  %s6752_s28 = smov %s6749_s29 }
0x16e2   : > { %s6753_s29 = smov %s6750_s0 }
0x16e3   :  { %34 = sbr.rel (!%p32_p3) target bundleno = 13 (0xd), region = 148 }
0x16ea   :  { %4642 = vsyncpa [#allocation3], 1 }
0x16eb   :  { %4644 = vsyncpa [#allocation3 + $0x1], 1 }

</bundles_post_ra>
